<compile_context>
chip_gen: v7x
topology: tpu7x:2x2x1
jax: 0.10.0
libtpu: 0.0.40
codegen_flags: <defaults>
</compile_context>

<pallas_src>
import math

import jax
import jax.numpy as jnp
from jax.experimental import pallas as pl
from jax.experimental.pallas import tpu as pltpu

# ----------------------------- configuration -------------------------------
H = 32            # hidden_size
NH = 4            # num_attention_heads
HD = H // NH      # attention_head_size
I = 64            # intermediate_size
NUM_LAYERS = 2    # num_hidden_layers
VOCAB = 50        # vocab_size
MAXPOS = 16       # max_position_embeddings
B = 4             # batch (2 SimCSE sentence pairs: [a0, a1, b0, b1])
S = 8             # sequence length
N = B * S         # total tokens
EPS = 1e-12       # layer_norm_eps
INIT_RANGE = 0.02
TEMP = 0.05       # SimCSE temperature
ATT_SCALE = 1.0 / math.sqrt(HD)

WLANES = 4 * H + 2 * I   # 256 lanes: [Q|K|V | O | I | W2^T] in the weight rows
WROWS = H + 2            # H weight rows + 1 bias row + 1 LayerNorm-param row


# ------------------------------ kernel helpers ------------------------------
def _layernorm(x, g, b):
    # PyTorch nn.LayerNorm: biased variance over last dim.
    mu = jnp.mean(x, axis=-1, keepdims=True)
    var = jnp.mean((x - mu) ** 2, axis=-1, keepdims=True)
    return (x - mu) * jax.lax.rsqrt(var + EPS) * g + b


def _gelu(x):
    # tanh-approx GELU (runs on the EUP tanh slot); differs from torch's
    # exact-erf GELU by ~1e-3 abs at most — accepted per perf review.
    return 0.5 * x * (1.0 + jnp.tanh(0.7978845608028654 * (x + 0.044715 * x * x * x)))


def _dot_nt(a, b):
    # a @ b.T without an explicit transpose (MXU handles the transposed RHS).
    return jax.lax.dot_general(a, b, (((1,), (1,)), ((), ())),
                               preferred_element_type=jnp.float32)


# ------------------------------- fused kernel -------------------------------
def bert_simcse_kernel(x_ref, attc_ref, wslab_ref, pslab_ref, loss_ref):
    f32 = jnp.float32

    # Attention constants, loaded once and reused by both layers.
    mask4 = attc_ref[0:N, :]                   # (N, NH*N) tiled block-diag additive mask
    blk_ones = attc_ref[N:N + NH * N, :]       # (NH*N, NH*N) head-block indicator

    # Per-head lane masks (1, H): ones on lanes [h*HD, (h+1)*HD).  Built once.
    lane = jax.lax.broadcasted_iota(jnp.int32, (1, H), 1)
    head_masks = [jnp.where((lane >= hh * HD) & (lane < (hh + 1) * HD),
                            jnp.float32(1.0), jnp.float32(0.0))
                  for hh in range(NH)]

    # BertEmbeddings: (word + position) already summed outside; LayerNorm here.
    emb_g = pslab_ref[H + 1:H + 2, :]
    emb_b = pslab_ref[H + 2:H + 3, :]
    h = _layernorm(x_ref[...], emb_g, emb_b)                    # (N, H)

    # BertEncoder: static unrolled layer loop; all weights VMEM-resident.
    for l in range(NUM_LAYERS):
        wl = wslab_ref[l]                                       # (H+2, 256) layer slab

        # Fused QKV projection; attention scale is pre-folded into the Q cols.
        qkv = (jnp.dot(h, wl[0:H, 0:3 * H], preferred_element_type=f32)
               + wl[H:H + 1, 0:3 * H])                          # (N, 3H)
        q = qkv[:, 0:H]
        k = qkv[:, H:2 * H]
        v = qkv[:, 2 * H:3 * H]

        # Blocked-head attention: stack lane-masked K/V along sublanes so all
        # NH heads are handled by three lane-dense MXU matmuls.
        k_stack = jnp.concatenate([k * head_masks[hh] for hh in range(NH)], axis=0)  # (NH*N, H)
        v_stack = jnp.concatenate([v * head_masks[hh] for hh in range(NH)], axis=0)  # (NH*N, H)

        scores = _dot_nt(q, k_stack) + mask4                    # (N, NH*N)
        m = jnp.max(scores, axis=-1, keepdims=True)             # row-global max (valid per block)
        e = jnp.exp(scores - m)
        den = jnp.dot(e, blk_ones, preferred_element_type=f32)  # per-head-block sums, broadcast
        p = e * pl.reciprocal(den, approx=True)                 # probs (dropout = identity)

        ctx = jnp.dot(p, v_stack, preferred_element_type=f32)   # (N, H): heads already concat'd

        attn = (jnp.dot(ctx, wl[0:H, 3 * H:4 * H], preferred_element_type=f32)
                + wl[H:H + 1, 3 * H:4 * H])
        h1 = _layernorm(attn + h, wl[H + 1:H + 2, 0:H], wl[H + 1:H + 2, H:2 * H])

        inter = _gelu(jnp.dot(h1, wl[0:H, 4 * H:4 * H + I], preferred_element_type=f32)
                      + wl[H:H + 1, 4 * H:4 * H + I])
        ffn = (_dot_nt(inter, wl[0:H, 4 * H + I:4 * H + 2 * I])        # W2 stored transposed
               + wl[H:H + 1, 4 * H + I:4 * H + I + H])
        h = _layernorm(ffn + h1, wl[H + 1:H + 2, 2 * H:3 * H], wl[H + 1:H + 2, 3 * H:4 * H])

    # SimcsePooler('cls'): dense + tanh on the CLS token of each sequence.
    # Rows are position-major, so CLS tokens are the first B rows, batch order.
    # (BertPooler's dense+tanh is computed by BertModel but unused by the loss.)
    cls = h[0:B, :]
    pooled = jnp.tanh(jnp.dot(cls, pslab_ref[0:H, :], preferred_element_type=f32)
                      + pslab_ref[H:H + 1, :])                  # (B, H)

    # In-batch contrastive loss: cosine(a_i, b_j)/temp, CE with labels=arange.
    # 1/temp is folded into the 'a'-side normalization.
    P = B // 2
    av = pooled[0:P, :]
    bv = pooled[P:2 * P, :]
    an = av * (jax.lax.rsqrt(jnp.sum(av * av, axis=-1, keepdims=True)) * (1.0 / TEMP))
    bn = bv * jax.lax.rsqrt(jnp.sum(bv * bv, axis=-1, keepdims=True))
    cosine = _dot_nt(an, bn)                                    # (P, P)

    m2 = jnp.max(cosine, axis=-1, keepdims=True)
    lse = m2 + jnp.log(jnp.sum(jnp.exp(cosine - m2), axis=-1, keepdims=True))  # (P, 1)
    row = jax.lax.broadcasted_iota(jnp.int32, (P, P), 0)
    col = jax.lax.broadcasted_iota(jnp.int32, (P, P), 1)
    diag = jnp.sum(jnp.where(row == col, cosine, 0.0), axis=-1, keepdims=True)  # (P, 1)
    # CrossEntropyLoss(reduction='mean'); ignore_index=-1 never triggers.
    loss_ref[...] = jnp.sum(lse - diag, axis=0, keepdims=True) * (1.0 / P)


def fused_forward(x, attn_consts, wslab, pslab):
    vmem = pltpu.MemorySpace.VMEM
    return pl.pallas_call(
        bert_simcse_kernel,
        out_shape=jax.ShapeDtypeStruct((1, 1), jnp.float32),
        in_specs=[pl.BlockSpec(memory_space=vmem) for _ in range(4)],
        out_specs=pl.BlockSpec(memory_space=vmem),
    )(x, attn_consts, wslab, pslab)


# ------------------------------- full forward -------------------------------
@jax.jit
def bert_for_simcse_forward(params, input_ids, attention_mask):
    Bb, Ss = input_ids.shape
    n = Bb * Ss

    # Embedding gathers stay in XLA (glue); add + LayerNorm happen in-kernel.
    we = params['word_emb'][input_ids]                     # (B, S, H)
    pe = params['pos_emb'][:Ss]                            # (S, H)
    # Position-major row layout: row = s * B + b  (CLS tokens = first B rows).
    x = jnp.transpose(we + pe[None, :, :], (1, 0, 2)).reshape(n, H)

    # (N, NH*N) additive mask, pre-tiled per head: BERT's (1 - mask) * -10000
    # for same-sequence keys, -10000 for cross-sequence keys (exp underflows
    # to 0, so the fused softmax matches the per-sequence softmax in f32).
    ext = (1.0 - attention_mask.astype(jnp.float32)) * -10000.0    # (B, S)
    ext_rows = jnp.transpose(ext).reshape(n)                       # key j = s*B + b
    rows = jnp.arange(n, dtype=jnp.int32)
    same = (rows[:, None] % Bb) == (rows[None, :] % Bb)
    mask = jnp.where(same, ext_rows[None, :], jnp.float32(-10000.0))
    mask4 = jnp.tile(mask, (1, NH))                                # (N, NH*N)

    # Constant head-block indicator for the fused per-head softmax denominator.
    hid = jnp.arange(NH * n, dtype=jnp.int32) // n
    blk_ones = (hid[:, None] == hid[None, :]).astype(jnp.float32)  # (NH*N, NH*N)

    attn_consts = jnp.concatenate([mask4, blk_ones], axis=0)       # (N + NH*N, NH*N)

    loss = fused_forward(x, attn_consts, params['wslab'], params['pslab'])
    return loss[0, 0]


# ------------------------------ parameter init ------------------------------
def init_params(key):
    L = NUM_LAYERS
    keys = jax.random.split(key, 3 + 6 * L)
    it = iter(keys)

    def nrm(shape):
        return INIT_RANGE * jax.random.normal(next(it), shape, jnp.float32)

    zeros = lambda w: jnp.zeros((1, w), jnp.float32)
    ones = lambda w: jnp.ones((1, w), jnp.float32)

    word_emb = nrm((VOCAB, H))
    pos_emb = nrm((MAXPOS, H))

    layer_slabs = []
    for _ in range(L):
        w_q, w_k, w_v = nrm((H, H)), nrm((H, H)), nrm((H, H))   # stored [in, out]
        w_o, w_i, w_2 = nrm((H, H)), nrm((H, I)), nrm((I, H))
        # Weight rows (H, 256): Q|K|V | O | I | W2^T ; 1/sqrt(HD) folded into Q.
        w_rows = jnp.concatenate(
            [w_q * ATT_SCALE, w_k, w_v, w_o, w_i, w_2.T], axis=1)
        # Bias row (1, 256): b_q*scale | b_k | b_v | b_o | b_i | b_2 | pad.
        b_row = jnp.concatenate(
            [zeros(H) * ATT_SCALE, zeros(H), zeros(H), zeros(H), zeros(I), zeros(H),
             zeros(WLANES - (4 * H + I + H))], axis=1)
        # LayerNorm row (1, 256): g1 | b1 | g2 | b2 | pad.
        ln_row = jnp.concatenate(
            [ones(H), zeros(H), ones(H), zeros(H), zeros(WLANES - 4 * H)], axis=1)
        layer_slabs.append(jnp.concatenate([w_rows, b_row, ln_row], axis=0))  # (H+2, 256)
    wslab = jnp.stack(layer_slabs, axis=0)                                    # (L, H+2, 256)

    # Pooler / embedding-LayerNorm slab (H+3, H):
    #   rows 0..H-1 : SimcsePooler dense weight [in, out]
    #   row  H      : pooler bias
    #   row  H+1    : embeddings LayerNorm gamma
    #   row  H+2    : embeddings LayerNorm beta
    pslab = jnp.concatenate([nrm((H, H)), zeros(H), ones(H), zeros(H)], axis=0)

    return dict(word_emb=word_emb, pos_emb=pos_emb, wslab=wslab, pslab=pslab)


# ----------------------------------- main -----------------------------------
if __name__ == "__main__":
    key = jax.random.PRNGKey(0)
    kp, kids = jax.random.split(key, 2)

    params = init_params(kp)

    input_ids = jax.random.randint(kids, (B, S), 1, VOCAB, dtype=jnp.int32)
    # 2 SimCSE pairs: batch[0:2] are "sentence A"s, batch[2:4] their positives;
    # last two sequences are padded to exercise the attention mask.
    attention_mask = jnp.array([[1] * 8,
                                [1] * 8,
                                [1] * 6 + [0] * 2,
                                [1] * 5 + [0] * 3], dtype=jnp.int32)

    loss = bert_for_simcse_forward(params, input_ids, attention_mask)
    loss = jax.block_until_ready(loss)
    assert loss.shape == () and bool(jnp.isfinite(loss))
    print("KERNEL_OK")
</pallas_src>

<mosaic_0001>
module attributes {stable_mosaic.version = 11 : i64} {
  func.func @bert_simcse_kernel(%arg0: memref<32x32xf32, #tpu.memory_space<vmem>>, %arg1: memref<160x128xf32, #tpu.memory_space<vmem>>, %arg2: memref<2x34x256xf32, #tpu.memory_space<vmem>>, %arg3: memref<35x32xf32, #tpu.memory_space<vmem>>, %arg4: memref<1x1xf32, #tpu.memory_space<vmem>>) attributes {dimension_semantics = [], scalar_prefetch = 0 : i64, scratch_operands = 0 : i64, tpu.core_type = #tpu.core_type<tc>} {
    %c0 = arith.constant 0 : index
    %c0_0 = arith.constant 0 : index
    %0 = vector.load %arg1[%c0, %c0_0] : memref<160x128xf32, #tpu.memory_space<vmem>>, vector<32x128xf32>
    %c32 = arith.constant 32 : index
    %c0_1 = arith.constant 0 : index
    %1 = vector.load %arg1[%c32, %c0_1] : memref<160x128xf32, #tpu.memory_space<vmem>>, vector<128x128xf32>
    %2 = tpu.iota {dimensions = array<i32: 1>} : vector<1x32xi32>
    %c0_i32 = arith.constant 0 : i32
    %3 = vector.broadcast %c0_i32 : i32 to vector<1x32xi32>
    %4 = arith.cmpi sge, %2, %3 : vector<1x32xi32>
    %c8_i32 = arith.constant 8 : i32
    %5 = vector.broadcast %c8_i32 : i32 to vector<1x32xi32>
    %6 = arith.cmpi slt, %2, %5 : vector<1x32xi32>
    %7 = arith.andi %4, %6 : vector<1x32xi1>
    %cst = arith.constant 1.000000e+00 : f32
    %cst_2 = arith.constant 0.000000e+00 : f32
    %8 = vector.broadcast %cst : f32 to vector<1x32xf32>
    %9 = vector.broadcast %cst_2 : f32 to vector<1x32xf32>
    %10 = arith.select %7, %8, %9 : vector<1x32xi1>, vector<1x32xf32>
    %c8_i32_3 = arith.constant 8 : i32
    %11 = vector.broadcast %c8_i32_3 : i32 to vector<1x32xi32>
    %12 = arith.cmpi sge, %2, %11 : vector<1x32xi32>
    %c16_i32 = arith.constant 16 : i32
    %13 = vector.broadcast %c16_i32 : i32 to vector<1x32xi32>
    %14 = arith.cmpi slt, %2, %13 : vector<1x32xi32>
    %15 = arith.andi %12, %14 : vector<1x32xi1>
    %cst_4 = arith.constant 1.000000e+00 : f32
    %cst_5 = arith.constant 0.000000e+00 : f32
    %16 = vector.broadcast %cst_4 : f32 to vector<1x32xf32>
    %17 = vector.broadcast %cst_5 : f32 to vector<1x32xf32>
    %18 = arith.select %15, %16, %17 : vector<1x32xi1>, vector<1x32xf32>
    %c16_i32_6 = arith.constant 16 : i32
    %19 = vector.broadcast %c16_i32_6 : i32 to vector<1x32xi32>
    %20 = arith.cmpi sge, %2, %19 : vector<1x32xi32>
    %c24_i32 = arith.constant 24 : i32
    %21 = vector.broadcast %c24_i32 : i32 to vector<1x32xi32>
    %22 = arith.cmpi slt, %2, %21 : vector<1x32xi32>
    %23 = arith.andi %20, %22 : vector<1x32xi1>
    %cst_7 = arith.constant 1.000000e+00 : f32
    %cst_8 = arith.constant 0.000000e+00 : f32
    %24 = vector.broadcast %cst_7 : f32 to vector<1x32xf32>
    %25 = vector.broadcast %cst_8 : f32 to vector<1x32xf32>
    %26 = arith.select %23, %24, %25 : vector<1x32xi1>, vector<1x32xf32>
    %c24_i32_9 = arith.constant 24 : i32
    %27 = vector.broadcast %c24_i32_9 : i32 to vector<1x32xi32>
    %28 = arith.cmpi sge, %2, %27 : vector<1x32xi32>
    %c32_i32 = arith.constant 32 : i32
    %29 = vector.broadcast %c32_i32 : i32 to vector<1x32xi32>
    %30 = arith.cmpi slt, %2, %29 : vector<1x32xi32>
    %31 = arith.andi %28, %30 : vector<1x32xi1>
    %cst_10 = arith.constant 1.000000e+00 : f32
    %cst_11 = arith.constant 0.000000e+00 : f32
    %32 = vector.broadcast %cst_10 : f32 to vector<1x32xf32>
    %33 = vector.broadcast %cst_11 : f32 to vector<1x32xf32>
    %34 = arith.select %31, %32, %33 : vector<1x32xi1>, vector<1x32xf32>
    %c33 = arith.constant 33 : index
    %c0_12 = arith.constant 0 : index
    %35 = vector.load %arg3[%c33, %c0_12] : memref<35x32xf32, #tpu.memory_space<vmem>>, vector<1x32xf32>
    %c34 = arith.constant 34 : index
    %c0_13 = arith.constant 0 : index
    %36 = vector.load %arg3[%c34, %c0_13] : memref<35x32xf32, #tpu.memory_space<vmem>>, vector<1x32xf32>
    %c0_14 = arith.constant 0 : index
    %c0_15 = arith.constant 0 : index
    %37 = vector.load %arg0[%c0_14, %c0_15] : memref<32x32xf32, #tpu.memory_space<vmem>>, vector<32x32xf32>
    %cst_16 = arith.constant dense<0.000000e+00> : vector<32xf32>
    %38 = vector.multi_reduction <add>, %37, %cst_16 [1] : vector<32x32xf32> to vector<32xf32>
    %39 = vector.shape_cast %38 : vector<32xf32> to vector<32x1xf32>
    %cst_17 = arith.constant 3.200000e+01 : f32
    %40 = vector.broadcast %cst_17 : f32 to vector<32x1xf32>
    %41 = arith.divf %39, %40 : vector<32x1xf32>
    %42 = vector.broadcast %41 : vector<32x1xf32> to vector<32x32xf32>
    %43 = arith.subf %37, %42 : vector<32x32xf32>
    %44 = arith.mulf %43, %43 : vector<32x32xf32>
    %cst_18 = arith.constant dense<0.000000e+00> : vector<32xf32>
    %45 = vector.multi_reduction <add>, %44, %cst_18 [1] : vector<32x32xf32> to vector<32xf32>
    %46 = vector.shape_cast %45 : vector<32xf32> to vector<32x1xf32>
    %cst_19 = arith.constant 3.200000e+01 : f32
    %47 = vector.broadcast %cst_19 : f32 to vector<32x1xf32>
    %48 = arith.divf %46, %47 : vector<32x1xf32>
    %49 = vector.broadcast %41 : vector<32x1xf32> to vector<32x32xf32>
    %50 = arith.subf %37, %49 : vector<32x32xf32>
    %cst_20 = arith.constant 9.99999996E-13 : f32
    %51 = vector.broadcast %cst_20 : f32 to vector<32x1xf32>
    %52 = arith.addf %48, %51 : vector<32x1xf32>
    %53 = math.rsqrt %52 : vector<32x1xf32>
    %54 = vector.broadcast %53 : vector<32x1xf32> to vector<32x32xf32>
    %55 = arith.mulf %50, %54 : vector<32x32xf32>
    %56 = vector.broadcast %35 : vector<1x32xf32> to vector<32x32xf32>
    %57 = arith.mulf %55, %56 : vector<32x32xf32>
    %58 = vector.broadcast %36 : vector<1x32xf32> to vector<32x32xf32>
    %59 = arith.addf %57, %58 : vector<32x32xf32>
    %c0_21 = arith.constant 0 : index
    %c0_22 = arith.constant 0 : index
    %c0_23 = arith.constant 0 : index
    %60 = vector.load %arg2[%c0_21, %c0_22, %c0_23] : memref<2x34x256xf32, #tpu.memory_space<vmem>>, vector<1x34x256xf32>
    %61 = vector.shape_cast %60 : vector<1x34x256xf32> to vector<34x256xf32>
    %62 = vector.extract_strided_slice %61 {offsets = [0, 0], sizes = [32, 96], strides = [1, 1]} : vector<34x256xf32> to vector<32x96xf32>
    %cst_24 = arith.constant dense<0.000000e+00> : vector<32x96xf32>
    %63 = tpu.matmul %59, %62, %cst_24 {dimension_numbers = #tpu.dot_dimension_numbers<[1], [0], [0], [1], [0, 0, 1, 1], [], []>} : vector<32x32xf32>, vector<32x96xf32>, vector<32x96xf32> -> vector<32x96xf32>
    %64 = vector.extract_strided_slice %61 {offsets = [32, 0], sizes = [1, 96], strides = [1, 1]} : vector<34x256xf32> to vector<1x96xf32>
    %65 = vector.broadcast %64 : vector<1x96xf32> to vector<32x96xf32>
    %66 = arith.addf %63, %65 : vector<32x96xf32>
    %67 = vector.extract_strided_slice %66 {offsets = [0, 0], sizes = [32, 32], strides = [1, 1]} : vector<32x96xf32> to vector<32x32xf32>
    %68 = vector.extract_strided_slice %66 {offsets = [0, 32], sizes = [32, 32], strides = [1, 1]} : vector<32x96xf32> to vector<32x32xf32>
    %69 = vector.extract_strided_slice %66 {offsets = [0, 64], sizes = [32, 32], strides = [1, 1]} : vector<32x96xf32> to vector<32x32xf32>
    %70 = vector.broadcast %10 : vector<1x32xf32> to vector<32x32xf32>
    %71 = arith.mulf %68, %70 : vector<32x32xf32>
    %72 = vector.broadcast %18 : vector<1x32xf32> to vector<32x32xf32>
    %73 = arith.mulf %68, %72 : vector<32x32xf32>
    %74 = vector.broadcast %26 : vector<1x32xf32> to vector<32x32xf32>
    %75 = arith.mulf %68, %74 : vector<32x32xf32>
    %76 = vector.broadcast %34 : vector<1x32xf32> to vector<32x32xf32>
    %77 = arith.mulf %68, %76 : vector<32x32xf32>
    %78 = tpu.concatenate %71, %73, %75, %77 in 0 : vector<32x32xf32>, vector<32x32xf32>, vector<32x32xf32>, vector<32x32xf32> -> vector<128x32xf32>
    %79 = vector.broadcast %10 : vector<1x32xf32> to vector<32x32xf32>
    %80 = arith.mulf %69, %79 : vector<32x32xf32>
    %81 = vector.broadcast %18 : vector<1x32xf32> to vector<32x32xf32>
    %82 = arith.mulf %69, %81 : vector<32x32xf32>
    %83 = vector.broadcast %26 : vector<1x32xf32> to vector<32x32xf32>
    %84 = arith.mulf %69, %83 : vector<32x32xf32>
    %85 = vector.broadcast %34 : vector<1x32xf32> to vector<32x32xf32>
    %86 = arith.mulf %69, %85 : vector<32x32xf32>
    %87 = tpu.concatenate %80, %82, %84, %86 in 0 : vector<32x32xf32>, vector<32x32xf32>, vector<32x32xf32>, vector<32x32xf32> -> vector<128x32xf32>
    %cst_25 = arith.constant dense<0.000000e+00> : vector<32x128xf32>
    %88 = tpu.matmul %67, %78, %cst_25 {dimension_numbers = #tpu.dot_dimension_numbers<[1], [1], [0], [0], [0, 0, 1, 0], [], []>} : vector<32x32xf32>, vector<128x32xf32>, vector<32x128xf32> -> vector<32x128xf32>
    %89 = arith.addf %88, %0 : vector<32x128xf32>
    %cst_26 = arith.constant dense<0xFF800000> : vector<32xf32>
    %90 = vector.multi_reduction <maximumf>, %89, %cst_26 [1] : vector<32x128xf32> to vector<32xf32>
    %91 = vector.shape_cast %90 : vector<32xf32> to vector<32x1xf32>
    %92 = vector.broadcast %91 : vector<32x1xf32> to vector<32x128xf32>
    %93 = arith.subf %89, %92 : vector<32x128xf32>
    %94 = math.exp %93 : vector<32x128xf32>
    %cst_27 = arith.constant dense<0.000000e+00> : vector<32x128xf32>
    %95 = tpu.matmul %94, %1, %cst_27 {dimension_numbers = #tpu.dot_dimension_numbers<[1], [0], [0], [1], [0, 0, 1, 1], [], []>} : vector<32x128xf32>, vector<128x128xf32>, vector<32x128xf32> -> vector<32x128xf32>
    %96 = tpu.reciprocal %95 {approx = true} : vector<32x128xf32> -> vector<32x128xf32>
    %97 = arith.mulf %94, %96 : vector<32x128xf32>
    %cst_28 = arith.constant dense<0.000000e+00> : vector<32x32xf32>
    %98 = tpu.matmul %97, %87, %cst_28 {dimension_numbers = #tpu.dot_dimension_numbers<[1], [0], [0], [1], [0, 0, 1, 1], [], []>} : vector<32x128xf32>, vector<128x32xf32>, vector<32x32xf32> -> vector<32x32xf32>
    %99 = vector.extract_strided_slice %61 {offsets = [0, 96], sizes = [32, 32], strides = [1, 1]} : vector<34x256xf32> to vector<32x32xf32>
    %cst_29 = arith.constant dense<0.000000e+00> : vector<32x32xf32>
    %100 = tpu.matmul %98, %99, %cst_29 {dimension_numbers = #tpu.dot_dimension_numbers<[1], [0], [0], [1], [0, 0, 1, 1], [], []>} : vector<32x32xf32>, vector<32x32xf32>, vector<32x32xf32> -> vector<32x32xf32>
    %101 = vector.extract_strided_slice %61 {offsets = [32, 96], sizes = [1, 32], strides = [1, 1]} : vector<34x256xf32> to vector<1x32xf32>
    %102 = vector.broadcast %101 : vector<1x32xf32> to vector<32x32xf32>
    %103 = arith.addf %100, %102 : vector<32x32xf32>
    %104 = arith.addf %103, %59 : vector<32x32xf32>
    %105 = vector.extract_strided_slice %61 {offsets = [33, 0], sizes = [1, 32], strides = [1, 1]} : vector<34x256xf32> to vector<1x32xf32>
    %106 = vector.extract_strided_slice %61 {offsets = [33, 32], sizes = [1, 32], strides = [1, 1]} : vector<34x256xf32> to vector<1x32xf32>
    %cst_30 = arith.constant dense<0.000000e+00> : vector<32xf32>
    %107 = vector.multi_reduction <add>, %104, %cst_30 [1] : vector<32x32xf32> to vector<32xf32>
    %108 = vector.shape_cast %107 : vector<32xf32> to vector<32x1xf32>
    %cst_31 = arith.constant 3.200000e+01 : f32
    %109 = vector.broadcast %cst_31 : f32 to vector<32x1xf32>
    %110 = arith.divf %108, %109 : vector<32x1xf32>
    %111 = vector.broadcast %110 : vector<32x1xf32> to vector<32x32xf32>
    %112 = arith.subf %104, %111 : vector<32x32xf32>
    %113 = arith.mulf %112, %112 : vector<32x32xf32>
    %cst_32 = arith.constant dense<0.000000e+00> : vector<32xf32>
    %114 = vector.multi_reduction <add>, %113, %cst_32 [1] : vector<32x32xf32> to vector<32xf32>
    %115 = vector.shape_cast %114 : vector<32xf32> to vector<32x1xf32>
    %cst_33 = arith.constant 3.200000e+01 : f32
    %116 = vector.broadcast %cst_33 : f32 to vector<32x1xf32>
    %117 = arith.divf %115, %116 : vector<32x1xf32>
    %118 = vector.broadcast %110 : vector<32x1xf32> to vector<32x32xf32>
    %119 = arith.subf %104, %118 : vector<32x32xf32>
    %cst_34 = arith.constant 9.99999996E-13 : f32
    %120 = vector.broadcast %cst_34 : f32 to vector<32x1xf32>
    %121 = arith.addf %117, %120 : vector<32x1xf32>
    %122 = math.rsqrt %121 : vector<32x1xf32>
    %123 = vector.broadcast %122 : vector<32x1xf32> to vector<32x32xf32>
    %124 = arith.mulf %119, %123 : vector<32x32xf32>
    %125 = vector.broadcast %105 : vector<1x32xf32> to vector<32x32xf32>
    %126 = arith.mulf %124, %125 : vector<32x32xf32>
    %127 = vector.broadcast %106 : vector<1x32xf32> to vector<32x32xf32>
    %128 = arith.addf %126, %127 : vector<32x32xf32>
    %129 = vector.extract_strided_slice %61 {offsets = [0, 128], sizes = [32, 64], strides = [1, 1]} : vector<34x256xf32> to vector<32x64xf32>
    %cst_35 = arith.constant dense<0.000000e+00> : vector<32x64xf32>
    %130 = tpu.matmul %128, %129, %cst_35 {dimension_numbers = #tpu.dot_dimension_numbers<[1], [0], [0], [1], [0, 0, 1, 1], [], []>} : vector<32x32xf32>, vector<32x64xf32>, vector<32x64xf32> -> vector<32x64xf32>
    %131 = vector.extract_strided_slice %61 {offsets = [32, 128], sizes = [1, 64], strides = [1, 1]} : vector<34x256xf32> to vector<1x64xf32>
    %132 = vector.broadcast %131 : vector<1x64xf32> to vector<32x64xf32>
    %133 = arith.addf %130, %132 : vector<32x64xf32>
    %cst_36 = arith.constant 5.000000e-01 : f32
    %134 = vector.broadcast %cst_36 : f32 to vector<32x64xf32>
    %135 = arith.mulf %134, %133 : vector<32x64xf32>
    %cst_37 = arith.constant 4.471500e-02 : f32
    %136 = vector.broadcast %cst_37 : f32 to vector<32x64xf32>
    %137 = arith.mulf %136, %133 : vector<32x64xf32>
    %138 = arith.mulf %137, %133 : vector<32x64xf32>
    %139 = arith.mulf %138, %133 : vector<32x64xf32>
    %140 = arith.addf %133, %139 : vector<32x64xf32>
    %cst_38 = arith.constant 0.797884583 : f32
    %141 = vector.broadcast %cst_38 : f32 to vector<32x64xf32>
    %142 = arith.mulf %141, %140 : vector<32x64xf32>
    %143 = math.tanh %142 : vector<32x64xf32>
    %cst_39 = arith.constant 1.000000e+00 : f32
    %144 = vector.broadcast %cst_39 : f32 to vector<32x64xf32>
    %145 = arith.addf %144, %143 : vector<32x64xf32>
    %146 = arith.mulf %135, %145 : vector<32x64xf32>
    %147 = vector.extract_strided_slice %61 {offsets = [0, 192], sizes = [32, 64], strides = [1, 1]} : vector<34x256xf32> to vector<32x64xf32>
    %cst_40 = arith.constant dense<0.000000e+00> : vector<32x32xf32>
    %148 = tpu.matmul %146, %147, %cst_40 {dimension_numbers = #tpu.dot_dimension_numbers<[1], [1], [0], [0], [0, 0, 1, 0], [], []>} : vector<32x64xf32>, vector<32x64xf32>, vector<32x32xf32> -> vector<32x32xf32>
    %149 = vector.extract_strided_slice %61 {offsets = [32, 192], sizes = [1, 32], strides = [1, 1]} : vector<34x256xf32> to vector<1x32xf32>
    %150 = vector.broadcast %149 : vector<1x32xf32> to vector<32x32xf32>
    %151 = arith.addf %148, %150 : vector<32x32xf32>
    %152 = arith.addf %151, %128 : vector<32x32xf32>
    %153 = vector.extract_strided_slice %61 {offsets = [33, 64], sizes = [1, 32], strides = [1, 1]} : vector<34x256xf32> to vector<1x32xf32>
    %154 = vector.extract_strided_slice %61 {offsets = [33, 96], sizes = [1, 32], strides = [1, 1]} : vector<34x256xf32> to vector<1x32xf32>
    %cst_41 = arith.constant dense<0.000000e+00> : vector<32xf32>
    %155 = vector.multi_reduction <add>, %152, %cst_41 [1] : vector<32x32xf32> to vector<32xf32>
    %156 = vector.shape_cast %155 : vector<32xf32> to vector<32x1xf32>
    %cst_42 = arith.constant 3.200000e+01 : f32
    %157 = vector.broadcast %cst_42 : f32 to vector<32x1xf32>
    %158 = arith.divf %156, %157 : vector<32x1xf32>
    %159 = vector.broadcast %158 : vector<32x1xf32> to vector<32x32xf32>
    %160 = arith.subf %152, %159 : vector<32x32xf32>
    %161 = arith.mulf %160, %160 : vector<32x32xf32>
    %cst_43 = arith.constant dense<0.000000e+00> : vector<32xf32>
    %162 = vector.multi_reduction <add>, %161, %cst_43 [1] : vector<32x32xf32> to vector<32xf32>
    %163 = vector.shape_cast %162 : vector<32xf32> to vector<32x1xf32>
    %cst_44 = arith.constant 3.200000e+01 : f32
    %164 = vector.broadcast %cst_44 : f32 to vector<32x1xf32>
    %165 = arith.divf %163, %164 : vector<32x1xf32>
    %166 = vector.broadcast %158 : vector<32x1xf32> to vector<32x32xf32>
    %167 = arith.subf %152, %166 : vector<32x32xf32>
    %cst_45 = arith.constant 9.99999996E-13 : f32
    %168 = vector.broadcast %cst_45 : f32 to vector<32x1xf32>
    %169 = arith.addf %165, %168 : vector<32x1xf32>
    %170 = math.rsqrt %169 : vector<32x1xf32>
    %171 = vector.broadcast %170 : vector<32x1xf32> to vector<32x32xf32>
    %172 = arith.mulf %167, %171 : vector<32x32xf32>
    %173 = vector.broadcast %153 : vector<1x32xf32> to vector<32x32xf32>
    %174 = arith.mulf %172, %173 : vector<32x32xf32>
    %175 = vector.broadcast %154 : vector<1x32xf32> to vector<32x32xf32>
    %176 = arith.addf %174, %175 : vector<32x32xf32>
    %c1 = arith.constant 1 : index
    %c0_46 = arith.constant 0 : index
    %c0_47 = arith.constant 0 : index
    %177 = vector.load %arg2[%c1, %c0_46, %c0_47] : memref<2x34x256xf32, #tpu.memory_space<vmem>>, vector<1x34x256xf32>
    %178 = vector.shape_cast %177 : vector<1x34x256xf32> to vector<34x256xf32>
    %179 = vector.extract_strided_slice %178 {offsets = [0, 0], sizes = [32, 96], strides = [1, 1]} : vector<34x256xf32> to vector<32x96xf32>
    %cst_48 = arith.constant dense<0.000000e+00> : vector<32x96xf32>
    %180 = tpu.matmul %176, %179, %cst_48 {dimension_numbers = #tpu.dot_dimension_numbers<[1], [0], [0], [1], [0, 0, 1, 1], [], []>} : vector<32x32xf32>, vector<32x96xf32>, vector<32x96xf32> -> vector<32x96xf32>
    %181 = vector.extract_strided_slice %178 {offsets = [32, 0], sizes = [1, 96], strides = [1, 1]} : vector<34x256xf32> to vector<1x96xf32>
    %182 = vector.broadcast %181 : vector<1x96xf32> to vector<32x96xf32>
    %183 = arith.addf %180, %182 : vector<32x96xf32>
    %184 = vector.extract_strided_slice %183 {offsets = [0, 0], sizes = [32, 32], strides = [1, 1]} : vector<32x96xf32> to vector<32x32xf32>
    %185 = vector.extract_strided_slice %183 {offsets = [0, 32], sizes = [32, 32], strides = [1, 1]} : vector<32x96xf32> to vector<32x32xf32>
    %186 = vector.extract_strided_slice %183 {offsets = [0, 64], sizes = [32, 32], strides = [1, 1]} : vector<32x96xf32> to vector<32x32xf32>
    %187 = vector.broadcast %10 : vector<1x32xf32> to vector<32x32xf32>
    %188 = arith.mulf %185, %187 : vector<32x32xf32>
    %189 = vector.broadcast %18 : vector<1x32xf32> to vector<32x32xf32>
    %190 = arith.mulf %185, %189 : vector<32x32xf32>
    %191 = vector.broadcast %26 : vector<1x32xf32> to vector<32x32xf32>
    %192 = arith.mulf %185, %191 : vector<32x32xf32>
    %193 = vector.broadcast %34 : vector<1x32xf32> to vector<32x32xf32>
    %194 = arith.mulf %185, %193 : vector<32x32xf32>
    %195 = tpu.concatenate %188, %190, %192, %194 in 0 : vector<32x32xf32>, vector<32x32xf32>, vector<32x32xf32>, vector<32x32xf32> -> vector<128x32xf32>
    %196 = vector.broadcast %10 : vector<1x32xf32> to vector<32x32xf32>
    %197 = arith.mulf %186, %196 : vector<32x32xf32>
    %198 = vector.broadcast %18 : vector<1x32xf32> to vector<32x32xf32>
    %199 = arith.mulf %186, %198 : vector<32x32xf32>
    %200 = vector.broadcast %26 : vector<1x32xf32> to vector<32x32xf32>
    %201 = arith.mulf %186, %200 : vector<32x32xf32>
    %202 = vector.broadcast %34 : vector<1x32xf32> to vector<32x32xf32>
    %203 = arith.mulf %186, %202 : vector<32x32xf32>
    %204 = tpu.concatenate %197, %199, %201, %203 in 0 : vector<32x32xf32>, vector<32x32xf32>, vector<32x32xf32>, vector<32x32xf32> -> vector<128x32xf32>
    %cst_49 = arith.constant dense<0.000000e+00> : vector<32x128xf32>
    %205 = tpu.matmul %184, %195, %cst_49 {dimension_numbers = #tpu.dot_dimension_numbers<[1], [1], [0], [0], [0, 0, 1, 0], [], []>} : vector<32x32xf32>, vector<128x32xf32>, vector<32x128xf32> -> vector<32x128xf32>
    %206 = arith.addf %205, %0 : vector<32x128xf32>
    %cst_50 = arith.constant dense<0xFF800000> : vector<32xf32>
    %207 = vector.multi_reduction <maximumf>, %206, %cst_50 [1] : vector<32x128xf32> to vector<32xf32>
    %208 = vector.shape_cast %207 : vector<32xf32> to vector<32x1xf32>
    %209 = vector.broadcast %208 : vector<32x1xf32> to vector<32x128xf32>
    %210 = arith.subf %206, %209 : vector<32x128xf32>
    %211 = math.exp %210 : vector<32x128xf32>
    %cst_51 = arith.constant dense<0.000000e+00> : vector<32x128xf32>
    %212 = tpu.matmul %211, %1, %cst_51 {dimension_numbers = #tpu.dot_dimension_numbers<[1], [0], [0], [1], [0, 0, 1, 1], [], []>} : vector<32x128xf32>, vector<128x128xf32>, vector<32x128xf32> -> vector<32x128xf32>
    %213 = tpu.reciprocal %212 {approx = true} : vector<32x128xf32> -> vector<32x128xf32>
    %214 = arith.mulf %211, %213 : vector<32x128xf32>
    %cst_52 = arith.constant dense<0.000000e+00> : vector<32x32xf32>
    %215 = tpu.matmul %214, %204, %cst_52 {dimension_numbers = #tpu.dot_dimension_numbers<[1], [0], [0], [1], [0, 0, 1, 1], [], []>} : vector<32x128xf32>, vector<128x32xf32>, vector<32x32xf32> -> vector<32x32xf32>
    %216 = vector.extract_strided_slice %178 {offsets = [0, 96], sizes = [32, 32], strides = [1, 1]} : vector<34x256xf32> to vector<32x32xf32>
    %cst_53 = arith.constant dense<0.000000e+00> : vector<32x32xf32>
    %217 = tpu.matmul %215, %216, %cst_53 {dimension_numbers = #tpu.dot_dimension_numbers<[1], [0], [0], [1], [0, 0, 1, 1], [], []>} : vector<32x32xf32>, vector<32x32xf32>, vector<32x32xf32> -> vector<32x32xf32>
    %218 = vector.extract_strided_slice %178 {offsets = [32, 96], sizes = [1, 32], strides = [1, 1]} : vector<34x256xf32> to vector<1x32xf32>
    %219 = vector.broadcast %218 : vector<1x32xf32> to vector<32x32xf32>
    %220 = arith.addf %217, %219 : vector<32x32xf32>
    %221 = arith.addf %220, %176 : vector<32x32xf32>
    %222 = vector.extract_strided_slice %178 {offsets = [33, 0], sizes = [1, 32], strides = [1, 1]} : vector<34x256xf32> to vector<1x32xf32>
    %223 = vector.extract_strided_slice %178 {offsets = [33, 32], sizes = [1, 32], strides = [1, 1]} : vector<34x256xf32> to vector<1x32xf32>
    %cst_54 = arith.constant dense<0.000000e+00> : vector<32xf32>
    %224 = vector.multi_reduction <add>, %221, %cst_54 [1] : vector<32x32xf32> to vector<32xf32>
    %225 = vector.shape_cast %224 : vector<32xf32> to vector<32x1xf32>
    %cst_55 = arith.constant 3.200000e+01 : f32
    %226 = vector.broadcast %cst_55 : f32 to vector<32x1xf32>
    %227 = arith.divf %225, %226 : vector<32x1xf32>
    %228 = vector.broadcast %227 : vector<32x1xf32> to vector<32x32xf32>
    %229 = arith.subf %221, %228 : vector<32x32xf32>
    %230 = arith.mulf %229, %229 : vector<32x32xf32>
    %cst_56 = arith.constant dense<0.000000e+00> : vector<32xf32>
    %231 = vector.multi_reduction <add>, %230, %cst_56 [1] : vector<32x32xf32> to vector<32xf32>
    %232 = vector.shape_cast %231 : vector<32xf32> to vector<32x1xf32>
    %cst_57 = arith.constant 3.200000e+01 : f32
    %233 = vector.broadcast %cst_57 : f32 to vector<32x1xf32>
    %234 = arith.divf %232, %233 : vector<32x1xf32>
    %235 = vector.broadcast %227 : vector<32x1xf32> to vector<32x32xf32>
    %236 = arith.subf %221, %235 : vector<32x32xf32>
    %cst_58 = arith.constant 9.99999996E-13 : f32
    %237 = vector.broadcast %cst_58 : f32 to vector<32x1xf32>
    %238 = arith.addf %234, %237 : vector<32x1xf32>
    %239 = math.rsqrt %238 : vector<32x1xf32>
    %240 = vector.broadcast %239 : vector<32x1xf32> to vector<32x32xf32>
    %241 = arith.mulf %236, %240 : vector<32x32xf32>
    %242 = vector.broadcast %222 : vector<1x32xf32> to vector<32x32xf32>
    %243 = arith.mulf %241, %242 : vector<32x32xf32>
    %244 = vector.broadcast %223 : vector<1x32xf32> to vector<32x32xf32>
    %245 = arith.addf %243, %244 : vector<32x32xf32>
    %246 = vector.extract_strided_slice %178 {offsets = [0, 128], sizes = [32, 64], strides = [1, 1]} : vector<34x256xf32> to vector<32x64xf32>
    %cst_59 = arith.constant dense<0.000000e+00> : vector<32x64xf32>
    %247 = tpu.matmul %245, %246, %cst_59 {dimension_numbers = #tpu.dot_dimension_numbers<[1], [0], [0], [1], [0, 0, 1, 1], [], []>} : vector<32x32xf32>, vector<32x64xf32>, vector<32x64xf32> -> vector<32x64xf32>
    %248 = vector.extract_strided_slice %178 {offsets = [32, 128], sizes = [1, 64], strides = [1, 1]} : vector<34x256xf32> to vector<1x64xf32>
    %249 = vector.broadcast %248 : vector<1x64xf32> to vector<32x64xf32>
    %250 = arith.addf %247, %249 : vector<32x64xf32>
    %cst_60 = arith.constant 5.000000e-01 : f32
    %251 = vector.broadcast %cst_60 : f32 to vector<32x64xf32>
    %252 = arith.mulf %251, %250 : vector<32x64xf32>
    %cst_61 = arith.constant 4.471500e-02 : f32
    %253 = vector.broadcast %cst_61 : f32 to vector<32x64xf32>
    %254 = arith.mulf %253, %250 : vector<32x64xf32>
    %255 = arith.mulf %254, %250 : vector<32x64xf32>
    %256 = arith.mulf %255, %250 : vector<32x64xf32>
    %257 = arith.addf %250, %256 : vector<32x64xf32>
    %cst_62 = arith.constant 0.797884583 : f32
    %258 = vector.broadcast %cst_62 : f32 to vector<32x64xf32>
    %259 = arith.mulf %258, %257 : vector<32x64xf32>
    %260 = math.tanh %259 : vector<32x64xf32>
    %cst_63 = arith.constant 1.000000e+00 : f32
    %261 = vector.broadcast %cst_63 : f32 to vector<32x64xf32>
    %262 = arith.addf %261, %260 : vector<32x64xf32>
    %263 = arith.mulf %252, %262 : vector<32x64xf32>
    %264 = vector.extract_strided_slice %178 {offsets = [0, 192], sizes = [32, 64], strides = [1, 1]} : vector<34x256xf32> to vector<32x64xf32>
    %cst_64 = arith.constant dense<0.000000e+00> : vector<32x32xf32>
    %265 = tpu.matmul %263, %264, %cst_64 {dimension_numbers = #tpu.dot_dimension_numbers<[1], [1], [0], [0], [0, 0, 1, 0], [], []>} : vector<32x64xf32>, vector<32x64xf32>, vector<32x32xf32> -> vector<32x32xf32>
    %266 = vector.extract_strided_slice %178 {offsets = [32, 192], sizes = [1, 32], strides = [1, 1]} : vector<34x256xf32> to vector<1x32xf32>
    %267 = vector.broadcast %266 : vector<1x32xf32> to vector<32x32xf32>
    %268 = arith.addf %265, %267 : vector<32x32xf32>
    %269 = arith.addf %268, %245 : vector<32x32xf32>
    %270 = vector.extract_strided_slice %178 {offsets = [33, 64], sizes = [1, 32], strides = [1, 1]} : vector<34x256xf32> to vector<1x32xf32>
    %271 = vector.extract_strided_slice %178 {offsets = [33, 96], sizes = [1, 32], strides = [1, 1]} : vector<34x256xf32> to vector<1x32xf32>
    %cst_65 = arith.constant dense<0.000000e+00> : vector<32xf32>
    %272 = vector.multi_reduction <add>, %269, %cst_65 [1] : vector<32x32xf32> to vector<32xf32>
    %273 = vector.shape_cast %272 : vector<32xf32> to vector<32x1xf32>
    %cst_66 = arith.constant 3.200000e+01 : f32
    %274 = vector.broadcast %cst_66 : f32 to vector<32x1xf32>
    %275 = arith.divf %273, %274 : vector<32x1xf32>
    %276 = vector.broadcast %275 : vector<32x1xf32> to vector<32x32xf32>
    %277 = arith.subf %269, %276 : vector<32x32xf32>
    %278 = arith.mulf %277, %277 : vector<32x32xf32>
    %cst_67 = arith.constant dense<0.000000e+00> : vector<32xf32>
    %279 = vector.multi_reduction <add>, %278, %cst_67 [1] : vector<32x32xf32> to vector<32xf32>
    %280 = vector.shape_cast %279 : vector<32xf32> to vector<32x1xf32>
    %cst_68 = arith.constant 3.200000e+01 : f32
    %281 = vector.broadcast %cst_68 : f32 to vector<32x1xf32>
    %282 = arith.divf %280, %281 : vector<32x1xf32>
    %283 = vector.broadcast %275 : vector<32x1xf32> to vector<32x32xf32>
    %284 = arith.subf %269, %283 : vector<32x32xf32>
    %cst_69 = arith.constant 9.99999996E-13 : f32
    %285 = vector.broadcast %cst_69 : f32 to vector<32x1xf32>
    %286 = arith.addf %282, %285 : vector<32x1xf32>
    %287 = math.rsqrt %286 : vector<32x1xf32>
    %288 = vector.broadcast %287 : vector<32x1xf32> to vector<32x32xf32>
    %289 = arith.mulf %284, %288 : vector<32x32xf32>
    %290 = vector.broadcast %270 : vector<1x32xf32> to vector<32x32xf32>
    %291 = arith.mulf %289, %290 : vector<32x32xf32>
    %292 = vector.broadcast %271 : vector<1x32xf32> to vector<32x32xf32>
    %293 = arith.addf %291, %292 : vector<32x32xf32>
    %294 = vector.extract_strided_slice %293 {offsets = [0, 0], sizes = [4, 32], strides = [1, 1]} : vector<32x32xf32> to vector<4x32xf32>
    %c0_70 = arith.constant 0 : index
    %c0_71 = arith.constant 0 : index
    %295 = vector.load %arg3[%c0_70, %c0_71] : memref<35x32xf32, #tpu.memory_space<vmem>>, vector<32x32xf32>
    %cst_72 = arith.constant dense<0.000000e+00> : vector<4x32xf32>
    %296 = tpu.matmul %294, %295, %cst_72 {dimension_numbers = #tpu.dot_dimension_numbers<[1], [0], [0], [1], [0, 0, 1, 1], [], []>} : vector<4x32xf32>, vector<32x32xf32>, vector<4x32xf32> -> vector<4x32xf32>
    %c32_73 = arith.constant 32 : index
    %c0_74 = arith.constant 0 : index
    %297 = vector.load %arg3[%c32_73, %c0_74] : memref<35x32xf32, #tpu.memory_space<vmem>>, vector<1x32xf32>
    %298 = vector.broadcast %297 : vector<1x32xf32> to vector<4x32xf32>
    %299 = arith.addf %296, %298 : vector<4x32xf32>
    %300 = math.tanh %299 : vector<4x32xf32>
    %301 = vector.extract_strided_slice %300 {offsets = [0, 0], sizes = [2, 32], strides = [1, 1]} : vector<4x32xf32> to vector<2x32xf32>
    %302 = vector.extract_strided_slice %300 {offsets = [2, 0], sizes = [2, 32], strides = [1, 1]} : vector<4x32xf32> to vector<2x32xf32>
    %303 = arith.mulf %301, %301 : vector<2x32xf32>
    %cst_75 = arith.constant dense<0.000000e+00> : vector<2xf32>
    %304 = vector.multi_reduction <add>, %303, %cst_75 [1] : vector<2x32xf32> to vector<2xf32>
    %305 = vector.shape_cast %304 : vector<2xf32> to vector<2x1xf32>
    %306 = math.rsqrt %305 : vector<2x1xf32>
    %cst_76 = arith.constant 2.000000e+01 : f32
    %307 = vector.broadcast %cst_76 : f32 to vector<2x1xf32>
    %308 = arith.mulf %306, %307 : vector<2x1xf32>
    %309 = vector.broadcast %308 : vector<2x1xf32> to vector<2x32xf32>
    %310 = arith.mulf %301, %309 : vector<2x32xf32>
    %311 = arith.mulf %302, %302 : vector<2x32xf32>
    %cst_77 = arith.constant dense<0.000000e+00> : vector<2xf32>
    %312 = vector.multi_reduction <add>, %311, %cst_77 [1] : vector<2x32xf32> to vector<2xf32>
    %313 = vector.shape_cast %312 : vector<2xf32> to vector<2x1xf32>
    %314 = math.rsqrt %313 : vector<2x1xf32>
    %315 = vector.broadcast %314 : vector<2x1xf32> to vector<2x32xf32>
    %316 = arith.mulf %302, %315 : vector<2x32xf32>
    %cst_78 = arith.constant dense<0.000000e+00> : vector<2x2xf32>
    %317 = tpu.matmul %310, %316, %cst_78 {dimension_numbers = #tpu.dot_dimension_numbers<[1], [1], [0], [0], [0, 0, 1, 0], [], []>} : vector<2x32xf32>, vector<2x32xf32>, vector<2x2xf32> -> vector<2x2xf32>
    %cst_79 = arith.constant dense<0xFF800000> : vector<2xf32>
    %318 = vector.multi_reduction <maximumf>, %317, %cst_79 [1] : vector<2x2xf32> to vector<2xf32>
    %319 = vector.shape_cast %318 : vector<2xf32> to vector<2x1xf32>
    %320 = vector.broadcast %319 : vector<2x1xf32> to vector<2x2xf32>
    %321 = arith.subf %317, %320 : vector<2x2xf32>
    %322 = math.exp %321 : vector<2x2xf32>
    %cst_80 = arith.constant dense<0.000000e+00> : vector<2xf32>
    %323 = vector.multi_reduction <add>, %322, %cst_80 [1] : vector<2x2xf32> to vector<2xf32>
    %324 = vector.shape_cast %323 : vector<2xf32> to vector<2x1xf32>
    %325 = math.log %324 : vector<2x1xf32>
    %326 = arith.addf %319, %325 : vector<2x1xf32>
    %327 = tpu.iota {dimensions = array<i32: 0>} : vector<2x2xi32>
    %328 = tpu.iota {dimensions = array<i32: 1>} : vector<2x2xi32>
    %329 = arith.cmpi eq, %327, %328 : vector<2x2xi32>
    %cst_81 = arith.constant 0.000000e+00 : f32
    %330 = vector.broadcast %cst_81 : f32 to vector<2x2xf32>
    %331 = arith.select %329, %317, %330 : vector<2x2xi1>, vector<2x2xf32>
    %cst_82 = arith.constant dense<0.000000e+00> : vector<2xf32>
    %332 = vector.multi_reduction <add>, %331, %cst_82 [1] : vector<2x2xf32> to vector<2xf32>
    %333 = vector.shape_cast %332 : vector<2xf32> to vector<2x1xf32>
    %334 = arith.subf %326, %333 : vector<2x1xf32>
    %cst_83 = arith.constant dense<0.000000e+00> : vector<1xf32>
    %335 = vector.multi_reduction <add>, %334, %cst_83 [0] : vector<2x1xf32> to vector<1xf32>
    %336 = vector.shape_cast %335 : vector<1xf32> to vector<1x1xf32>
    %cst_84 = arith.constant 5.000000e-01 : f32
    %337 = vector.broadcast %cst_84 : f32 to vector<1x1xf32>
    %338 = arith.mulf %336, %337 : vector<1x1xf32>
    %c0_85 = arith.constant 0 : index
    %c0_86 = arith.constant 0 : index
    %339 = vector.load %arg4[%c0_85, %c0_86] : memref<1x1xf32, #tpu.memory_space<vmem>>, vector<1x1xf32>
    tpu.vector_store %arg4[%c0_85, %c0_86], %338 {strides = array<i32>} : memref<1x1xf32, #tpu.memory_space<vmem>>, vector<1x1xf32>,
    return
  }
}

</mosaic_0001>

<bundles_post_ra>
// kernel: tile.9
= control target key start
LH: loop header
LB: loop body
LE: loop exit
PB: predicated region body
PF: predicated region fallthrough
CT: control target
= control target key end

     0   :  { %vm162_vm0 = vcmask 1047556   ;;  %s398_s10 = smov 96   ;;  %vm164_vm1 = vcmask 261120   ;;  %s400_s21 = smov 32   ;;  %vm201_vm2 = vcmask 1048320   ;;  %vm244_vm3 = vcmask 785920   ;;  %s579_s0 = inlined_call_operand.vmem [shape: f32[32,4,32], index: 0, kind: input, shape index: {}]   ;;  %s580_s1 = inlined_call_operand.vmem [shape: f32[32,128], index: 1, kind: output, shape index: {}]  }
   0x1   :  { %v376_v0 = vld [vmem:[%s579_s0 + $0x1c] sm:$0xf]  ;;  %v377_v1 = vld [vmem:[%s579_s0 + $0x18] sm:$0xf]  ;;  %v378_v2 = vld [vmem:[%s579_s0 + $0x14] sm:$0xf] }
   0x2   :  { %128 = vst [vmem:[#allocation0 + $0x38] sm:$0xf] %v376_v0  ;;  %133 = vst [vmem:[#allocation0 + $0x30] sm:$0xf] %v377_v1  ;;  %v379_v3 = vld [vmem:[%s579_s0 + $0x10] sm:$0xf] }
   0x3   :  { %138 = vst [vmem:[#allocation0 + $0x28] sm:$0xf] %v378_v2  ;;  %v380_v4 = vld [vmem:[%s579_s0 + $0xc] sm:$0xf]  ;;  %v381_v5 = vld [vmem:[%s579_s0 + $0x8] sm:$0xf] }
   0x4   :  { %143 = vst [vmem:[#allocation0 + $0x20] sm:$0xf] %v379_v3  ;;  %148 = vst [vmem:[#allocation0 + $0x18] sm:$0xf] %v380_v4  ;;  %v382_v6 = vld [vmem:[%s579_s0 + $0x4] sm:$0xf] }
   0x5   :  { %153 = vst [vmem:[#allocation0 + $0x10] sm:$0xf] %v381_v5  ;;  %v158_v7 = vld [vmem:[%s579_s0] sm:$0xf]  ;;  %157 = vst [vmem:[#allocation0 + $0x8] sm:$0xf] %v382_v6 }
   0x6   :  { %159 = vst [vmem:[#allocation0] sm:$0xf] %v158_v7  ;;  %v360_v8 = vld [vmem:[%s579_s0 + $0x5c] sm:$0xf]  ;;  %v361_v9 = vld [vmem:[%s579_s0 + $0x58] sm:$0xf] }
   0x7   :  { %v362_v10 = vld [vmem:[%s579_s0 + $0x54] sm:$0xf]  ;;  %48 = vst [vmem:[#allocation0 + $0xb8] sm:$0xf] %v360_v8  ;;  %53 = vst [vmem:[#allocation0 + $0xb0] sm:$0xf] %v361_v9 }
   0x8   :  { %58 = vst [vmem:[#allocation0 + $0xa8] sm:$0xf] %v362_v10  ;;  %v363_v11 = vld [vmem:[%s579_s0 + $0x50] sm:$0xf]  ;;  %v364_v12 = vld [vmem:[%s579_s0 + $0x4c] sm:$0xf] }
   0x9   :  { %v365_v13 = vld [vmem:[%s579_s0 + $0x48] sm:$0xf]  ;;  %63 = vst [vmem:[#allocation0 + $0xa0] sm:$0xf] %v363_v11  ;;  %68 = vst [vmem:[#allocation0 + $0x98] sm:$0xf] %v364_v12 }
   0xa   :  { %73 = vst [vmem:[#allocation0 + $0x90] sm:$0xf] %v365_v13  ;;  %v366_v14 = vld [vmem:[%s579_s0 + $0x44] sm:$0xf]  ;;  %v367_v15 = vld [vmem:[%s579_s0 + $0x40] sm:$0xf] }
   0xb   :  { %v368_v16 = vld [vmem:[%s579_s0 + $0x3c] sm:$0xf]  ;;  %78 = vst [vmem:[#allocation0 + $0x88] sm:$0xf] %v366_v14  ;;  %83 = vst [vmem:[#allocation0 + $0x80] sm:$0xf] %v367_v15 }
   0xc   :  { %88 = vst [vmem:[#allocation0 + $0x78] sm:$0xf] %v368_v16  ;;  %v369_v17 = vld [vmem:[%s579_s0 + $0x38] sm:$0xf]  ;;  %v370_v18 = vld [vmem:[%s579_s0 + $0x34] sm:$0xf] }
   0xd   :  { %v371_v19 = vld [vmem:[%s579_s0 + $0x30] sm:$0xf]  ;;  %93 = vst [vmem:[#allocation0 + $0x70] sm:$0xf] %v369_v17  ;;  %98 = vst [vmem:[#allocation0 + $0x68] sm:$0xf] %v370_v18 }
   0xe   :  { %103 = vst [vmem:[#allocation0 + $0x60] sm:$0xf] %v371_v19  ;;  %v372_v20 = vld [vmem:[%s579_s0 + $0x2c] sm:$0xf]  ;;  %v373_v21 = vld [vmem:[%s579_s0 + $0x28] sm:$0xf] }
   0xf   :  { %v374_v22 = vld [vmem:[%s579_s0 + $0x24] sm:$0xf]  ;;  %108 = vst [vmem:[#allocation0 + $0x58] sm:$0xf] %v372_v20  ;;  %113 = vst [vmem:[#allocation0 + $0x50] sm:$0xf] %v373_v21 }
  0x10   :  { %118 = vst [vmem:[#allocation0 + $0x48] sm:$0xf] %v374_v22  ;;  %v375_v23 = vld [vmem:[%s579_s0 + $0x20] sm:$0xf]  ;;  %v352_v24 = vld [vmem:[%s579_s0 + $0x7c] sm:$0xf] }
  0x11   :  { %v353_v25 = vld [vmem:[%s579_s0 + $0x78] sm:$0xf]  ;;  %123 = vst [vmem:[#allocation0 + $0x40] sm:$0xf] %v375_v23  ;;  %8 = vst [vmem:[#allocation0 + $0xf8] sm:$0xf] %v352_v24 }
  0x12   :  { %v196_v26 = vld [vmem:[#allocation0 + $0x3] ss:$8 sm:$0xf0]   ;;  %13 = vst [vmem:[#allocation0 + $0xf0] sm:$0xf] %v353_v25  ;;  %vm287_vm4 = vcmask 523520  }
  0x13   :  { %v354_v27 = vld [vmem:[%s579_s0 + $0x74] sm:$0xf]  ;;  %v194_v28 = vld [vmem:[#allocation0 + $0x3] ss:$8 sm:$0xf]  }
  0x14   :  { %18 = vst [vmem:[#allocation0 + $0xe8] sm:$0xf] %v354_v27  ;;  %v355_v29 = vld [vmem:[%s579_s0 + $0x70] sm:$0xf]  ;;  %v198_v30 = vsel %vm162_vm0, %v196_v26, %v194_v28  ;;  %v356_v31 = vld [vmem:[%s579_s0 + $0x6c] sm:$0xf] }
  0x15   :  { %23 = vst [vmem:[#allocation0 + $0xe0] sm:$0xf] %v355_v29  ;;  %v357_v32 = vld [vmem:[%s579_s0 + $0x68] sm:$0xf]  ;;  %v358_v33 = vld [vmem:[%s579_s0 + $0x64] sm:$0xf]  ;;  %199 = vrot.lane.b32.xlu0 %v198_v30, %s398_s10 }
  0x16   :  { %v217_v34 = vld [vmem:[#allocation0 + $0x83] ss:$8 sm:$0xf0]   ;;  %28 = vst [vmem:[#allocation0 + $0xd8] sm:$0xf] %v356_v31 }
  0x17   :  { %33 = vst [vmem:[#allocation0 + $0xd0] sm:$0xf] %v357_v32  ;;  %38 = vst [vmem:[#allocation0 + $0xc8] sm:$0xf] %v358_v33  ;;  %v359_v35 = vld [vmem:[%s579_s0 + $0x60] sm:$0xf] }
  0x18   :  { %v215_v36 = vld [vmem:[#allocation0 + $0x83] ss:$8 sm:$0xf]   ;;  %43 = vst [vmem:[#allocation0 + $0xc0] sm:$0xf] %v359_v35  ;;  %s399_s0 = smov 64  }
  0x19   :  { %v219_v37 = vsel %vm162_vm0, %v217_v34, %v215_v36  ;;  %v206_v38 = vld [vmem:[#allocation0 + $0x43] ss:$8 sm:$0xf0]   ;;  %v237_v39 = vld [vmem:[#allocation0 + $0x2] ss:$8 sm:$0xf]  }
  0x1a   :  { %220 = vrot.lane.b32.xlu1 %v219_v37, %s398_s10  ;;  %v204_v40 = vld [vmem:[#allocation0 + $0x43] ss:$8 sm:$0xf]   ;;  %v239_v41 = vld [vmem:[#allocation0 + $0x2] ss:$8 sm:$0xf0]  }
  0x1b   :  { %v208_v42 = vsel %vm162_vm0, %v206_v38, %v204_v40  ;;  %v249_v44 = vld [vmem:[#allocation0 + $0x42] ss:$8 sm:$0xf0]   ;;  %v241_v45 = vsel %vm162_vm0, %v239_v41, %v237_v39  ;;  %v280_v52 = vld [vmem:[#allocation0 + $0x1] ss:$8 sm:$0xf]  }
  0x1c   :  { %209 = vrot.lane.b32.xlu0 %v208_v42, %s398_s10  ;;  %v228_v43 = vld [vmem:[#allocation0 + $0xc3] ss:$8 sm:$0xf0]   ;;  %v247_v46 = vld [vmem:[#allocation0 + $0x42] ss:$8 sm:$0xf]  }
  0x1d   :  { %v258_v47 = vld [vmem:[#allocation0 + $0x82] ss:$8 sm:$0xf]   ;;  %v251_v53 = vsel %vm162_vm0, %v249_v44, %v247_v46  ;;  %v282_v55 = vld [vmem:[#allocation0 + $0x1] ss:$8 sm:$0xf0]  }
  0x1e   :  { %v260_v49 = vld [vmem:[#allocation0 + $0x82] ss:$8 sm:$0xf0]   ;;  %v160_v56 = vld [vmem:[#allocation0] ss:$8 sm:$0xf]   ;;  %v284_v4 = vsel %vm162_vm0, %v282_v55, %v280_v52 }
  0x1f   :  { %v226_v48 = vld [vmem:[#allocation0 + $0xc3] ss:$8 sm:$0xf]   ;;  %v271_v51 = vld [vmem:[#allocation0 + $0xc2] ss:$8 sm:$0xf0]   ;;  %v262_v54 = vsel %vm162_vm0, %v260_v49, %v258_v47 }
  0x20   :  { %v230_v50 = vsel %vm162_vm0, %v228_v43, %v226_v48  ;;  %242 = vrot.lane.b32.xlu0 %v241_v45, %s399_s0  ;;  %v269_v57 = vld [vmem:[#allocation0 + $0xc2] ss:$8 sm:$0xf]   ;;  %v161_v58 = vld [vmem:[#allocation0] ss:$8 sm:$0xf0]  }
  0x21   :  { %231 = vrot.lane.b32.xlu1 %v230_v50, %s398_s10  ;;  %v163_v59 = vsel %vm162_vm0, %v161_v58, %v160_v56  ;;  %v176_v60 = vld [vmem:[#allocation0 + $0x80] ss:$8 sm:$0xf]   ;;  %v290_v62 = vld [vmem:[#allocation0 + $0x41] ss:$8 sm:$0xf]   ;;  %v273_v3 = vsel %vm162_vm0, %v271_v51, %v269_v57 }
  0x22   :  { %v178_v61 = vld [vmem:[#allocation0 + $0x80] ss:$8 sm:$0xf0]   ;;  %v292_v63 = vld [vmem:[#allocation0 + $0x41] ss:$8 sm:$0xf0]  }
  0x23   :  { %165 = vst.msk [vmem:[%s580_s1] sm:$0xff] %vm164_vm1, %v163_v59   ;;  %v180_v0 = vsel %vm162_vm0, %v178_v61, %v176_v60  ;;  %v167_v1 = vld [vmem:[#allocation0 + $0x40] ss:$8 sm:$0xf]   ;;  %v294_v11 = vsel %vm162_vm0, %v292_v63, %v290_v62 }
  0x24   :  { %263 = vrot.lane.b32.xlu0 %v262_v54, %s399_s0  ;;  %v169_v2 = vld [vmem:[#allocation0 + $0x40] ss:$8 sm:$0xf0]   ;;  %384 = vst.msk [vmem:[%s580_s1 + $0x10] sm:$0xff] %vm164_vm1, %v180_v0  }
  0x25   :  { %252 = vrot.lane.b32.xlu1 %v251_v53, %s399_s0  ;;  %v171_v5 = vsel %vm162_vm0, %v169_v2, %v167_v1  ;;  %v185_v6 = vld [vmem:[#allocation0 + $0xc0] ss:$8 sm:$0xf]   ;;  %v301_v8 = vld [vmem:[#allocation0 + $0x81] ss:$8 sm:$0xf]  }
  0x26   :  { %v187_v7 = vld [vmem:[#allocation0 + $0xc0] ss:$8 sm:$0xf0]   ;;  %v303_v9 = vld [vmem:[#allocation0 + $0x81] ss:$8 sm:$0xf0]  }
  0x27   :  { %383 = vst.msk [vmem:[%s580_s1 + $0x8] sm:$0xff] %vm164_vm1, %v171_v5   ;;  %v189_v10 = vsel %vm162_vm0, %v187_v7, %v185_v6  ;;  %v305_v12 = vsel %vm162_vm0, %v303_v9, %v301_v8  ;;  %v312_v13 = vld [vmem:[#allocation0 + $0xc1] ss:$8 sm:$0xf]  }
  0x28   :  { %385 = vst.msk [vmem:[%s580_s1 + $0x18] sm:$0xff] %vm164_vm1, %v189_v10   ;;  %285 = vrot.lane.b32.xlu0 %v284_v4, %s400_s21  ;;  %v314_v14 = vld [vmem:[#allocation0 + $0xc1] ss:$8 sm:$0xf0]  }
  0x29   :  { %274 = vrot.lane.b32.xlu1 %v273_v3, %s399_s0  ;;  %v316_v15 = vsel %vm162_vm0, %v314_v14, %v312_v13 }
  0x2c   :  { %306 = vrot.lane.b32.xlu0 %v305_v12, %s400_s21 }
  0x2d   :  { %295 = vrot.lane.b32.xlu1 %v294_v11, %s400_s21 }
  0x31   :  { %317 = vrot.lane.b32.xlu1 %v316_v15, %s400_s21 }
  0x87   :  { %v200_v16 = vpop.permute.xlu0 %199  }
  0x88   :  { %202 = vst.msk [vmem:[%s580_s1] sm:$0xff] %vm201_vm2, %v200_v16  }
  0x8c   :  { %v221_v17 = vpop.permute.xlu1 %220  }
  0x8d   :  { %387 = vst.msk [vmem:[%s580_s1 + $0x10] sm:$0xff] %vm201_vm2, %v221_v17  }
  0x8e   :  { %v210_v18 = vpop.permute.xlu0 %209  }
  0x8f   :  { %386 = vst.msk [vmem:[%s580_s1 + $0x8] sm:$0xff] %vm201_vm2, %v210_v18  }
  0x92   :  { %v243_v20 = vpop.permute.xlu0 %242  }
  0x93   :  { %v232_v19 = vpop.permute.xlu1 %231   ;;  %245 = vst.msk [vmem:[%s580_s1] sm:$0xff] %vm244_vm3, %v243_v20  }
  0x94   :  { %388 = vst.msk [vmem:[%s580_s1 + $0x18] sm:$0xff] %vm201_vm2, %v232_v19  }
  0x96   :  { %v264_v22 = vpop.permute.xlu0 %263  }
  0x97   :  { %v253_v21 = vpop.permute.xlu1 %252   ;;  %390 = vst.msk [vmem:[%s580_s1 + $0x10] sm:$0xff] %vm244_vm3, %v264_v22  }
  0x98   :  { %389 = vst.msk [vmem:[%s580_s1 + $0x8] sm:$0xff] %vm244_vm3, %v253_v21  }
  0x9a   :  { %v286_v24 = vpop.permute.xlu0 %285  }
  0x9b   :  { %v275_v23 = vpop.permute.xlu1 %274   ;;  %288 = vst.msk [vmem:[%s580_s1] sm:$0xff] %vm287_vm4, %v286_v24  }
  0x9c   :  { %391 = vst.msk [vmem:[%s580_s1 + $0x18] sm:$0xff] %vm244_vm3, %v275_v23  }
  0x9e   :  { %v307_v26 = vpop.permute.xlu0 %306  }
  0x9f   :  { %v296_v25 = vpop.permute.xlu1 %295   ;;  %393 = vst.msk [vmem:[%s580_s1 + $0x10] sm:$0xff] %vm287_vm4, %v307_v26  }
  0xa0   :  { %392 = vst.msk [vmem:[%s580_s1 + $0x8] sm:$0xff] %vm287_vm4, %v296_v25  }
  0xa3   :  { %v318_v27 = vpop.permute.xlu1 %317  }
  0xa4   :  { %394 = vst.msk [vmem:[%s580_s1 + $0x18] sm:$0xff] %vm287_vm4, %v318_v27  }

// kernel: bert_for_simcse_forward.1
= control target key start
LH: loop header
LB: loop body
LE: loop exit
PB: predicated region body
PF: predicated region fallthrough
CT: control target
= control target key end

     0   :  { %vm62_vm0 = vcmask 261120   ;;  %s4700_s0 = inlined_call_operand.vmem [shape: f32[32,32], index: 0, kind: input, shape index: {}]   ;;  %s4701_s1 = inlined_call_operand.vmem [shape: f32[160,128], index: 1, kind: input, shape index: {}]   ;;  %s4702_s2 = inlined_call_operand.vmem [shape: f32[2,34,256], index: 2, kind: input, shape index: {}]   ;;  %s4703_s3 = inlined_call_operand.vmem [shape: f32[35,32], index: 3, kind: input, shape index: {}]   ;;  %s4704_s4 = inlined_call_operand.hbm [shape: f32[1,1], index: 4, kind: output, shape index: {}]  }
   0x1   :  { %v58_v0 = vld [vmem:[%s4700_s0] sm:$0xff]  ;;  %v60_v1 = vld [vmem:[%s4700_s0 + $0x10] sm:$0xff]  ;;  %v59_v2 = vld [vmem:[%s4700_s0 + $0x8] sm:$0xff] }
   0x2   :  { %v63_v3 = vsel %vm62_vm0, %v58_v0, 0.0  ;;  %v69_v4 = vsel %vm62_vm0, %v60_v1, 0.0  ;;  %v61_v5 = vld [vmem:[%s4700_s0 + $0x18] sm:$0xff] }
   0x3   :  { %9 = vsyncpa [#allocation3], 0  ;;  %64 = vadd.xlane.f32.xlu0 %v63_v3  ;;  %70 = vadd.xlane.f32.xlu1 %v69_v4  ;;  %v66_v6 = vsel %vm62_vm0, %v59_v2, 0.0  ;;  %v72_v7 = vsel %vm62_vm0, %v61_v5, 0.0  ;;  %v3872_v28 = vld [vmem:[%s4702_s2] sm:$0xff]  ;;  %v3877_v29 = vld [vmem:[%s4702_s2 + $0x10] sm:$0xff]  ;;  %v38_v35 = vlaneseq }
   0x4   :  { %v3882_v30 = vld [vmem:[%s4702_s2 + $0x20] sm:$0xff]  ;;  %v3561_v31 = vpack.i.bf16 %v3877_v29, %v3872_v28  ;;  %v3172_v32 = vpack.c.bf16 %v3877_v29, %v3872_v28  ;;  %v3891_v33 = vld [vmem:[%s4702_s2 + $0x30] sm:$0xff]  ;;  %v3801_v37 = vmov 0.0   ;;  %s3802_s30 = smov 32   ;;  %s3803_s11 = smov 96   ;;  %vm4028_vm11 = vmpackc.low %vm62_vm0, %vm62_vm0  ;;  %vm1084_vm12 = vcmask 523264  }
   0x5   :  { %v3176_v34 = vpack.c.bf16 %v3891_v33, %v3882_v30  ;;  %v3895_v36 = vand.u32 127, %v38_v35  ;;  %v2529_v55 = vld [vmem:[%s4703_s3 + $0x21] ss:$0 sm:$0xff]  ;;  %v2530_v57 = vld [vmem:[%s4703_s3 + $0x22] ss:$0 sm:$0xff]  ;;  %s3804_s15 = smov 64   ;;  %vm4311_vm13 = vmpackc.low %vm1084_vm12, %vm1084_vm12 }
   0x6   :  { %3173 = vmatprep.subr.bf16.mxu0 %v3172_v32  ;;  %vm3806_vm14 = vmmov 0   ;;  %vm2400_vm15 = vcmask 257026  }
   0x7   :  { %67 = vadd.xlane.f32.xlu0 %v66_v6  ;;  %73 = vadd.xlane.f32.xlu1 %v72_v7  ;;  %vm44_vm1 = vcmp.ge.s32.totalorder %v3895_v36, 8  ;;  %vm45_vm2 = vcmp.lt.s32.totalorder %v3895_v36, 16  ;;  %vm48_vm3 = vcmp.ge.s32.totalorder %v3895_v36, 16  ;;  %vm49_vm4 = vcmp.lt.s32.totalorder %v3895_v36, 24 }
   0x8   :  { %3175 = vmatpush3.bf16.msra.mxu0 %v3172_v32  ;;  %vm46_vm5 = vmand %vm44_vm1, %vm45_vm2  ;;  %vm41_vm6 = vcmp.lt.s32.totalorder %v3895_v36, 8  ;;  %vm52_vm8 = vcmp.ge.s32.totalorder %v3895_v36, 24  ;;  %vm53_vm9 = vcmp.lt.s32.totalorder %v3895_v36, 32  ;;  %vm2393_vm1 = vcmask 254976  }
   0x9   :  { %3177 = vmatprep.subr.bf16.mxu0 %v3176_v34  ;;  %v3903_v38 = vsel %vm46_vm5, 1.0, %v3801_v37  ;;  %vm50_vm7 = vmand %vm48_vm3, %vm49_vm4  ;;  %v3908_v39 = vsel %vm41_vm6, 1.0, %v3801_v37  ;;  %vm2483_vm2 = vcmask 9216   ;;  %vm2513_vm4 = vcmask 0  }
   0xa   :  { %v3915_v40 = vsel %vm50_vm7, 1.0, %v3801_v37  ;;  %vm54_vm10 = vmand %vm52_vm8, %vm53_vm9 }
   0xb   :  { %v3920_v41 = vsel %vm54_vm10, 1.0, %v3801_v37 }
   0xc   :  { %3179 = vmatpush3.bf16.msra.mxu0 %v3176_v34 }
  0x90   :  { %v65_v8 = vpop.xlane.xlu0 %64  ;;  %v71_v9 = vpop.xlane.xlu1 %70 }
  0x91   :  { %v76_v10 = vmul.f32 0.03125, %v65_v8  ;;  %v78_v11 = vmul.f32 0.03125, %v71_v9  ;;  %v3950_v8 = vshrl.u32 %v38_v35, 7 }
  0x93   :  { %v3849_v12 = vsub.f32 %v58_v0, %v76_v10  ;;  %v3851_v13 = vsub.f32 %v60_v1, %v78_v11  ;;  %v3953_v9 = vsub.s32 0, %v3950_v8  ;;  %v3958_v10 = vld [vmem:[%s4702_s2 + $0x40] sm:$0x3]  ;;  %vm2498_vm3 = vcmp.eq.s32.totalorder %v3950_v8, %v3895_v36 }
  0x94   :  { %v68_v14 = vpop.xlane.xlu0 %67  ;;  %v74_v15 = vpop.xlane.xlu1 %73 }
  0x95   :  { %v77_v16 = vmul.f32 0.03125, %v68_v14  ;;  %v79_v17 = vmul.f32 0.03125, %v74_v15  ;;  %v84_v18 = vmul.f32 %v3849_v12, %v3849_v12  ;;  %v86_v19 = vmul.f32 %v3851_v13, %v3851_v13 }
  0x96   :  { %v3962_v11 = vrot.slane %v3958_v10, %v3953_v9 }
  0x97   :  { %v3857_v20 = vsub.f32 %v59_v2, %v77_v16  ;;  %v3859_v21 = vsub.f32 %v61_v5, %v79_v17  ;;  %v88_v22 = vsel %vm62_vm0, %v84_v18, 0.0  ;;  %v94_v23 = vsel %vm62_vm0, %v86_v19, 0.0 }
  0x98   :  { %89 = vadd.xlane.f32.xlu0 %v88_v22 }
  0x99   :  { %v85_v24 = vmul.f32 %v3857_v20, %v3857_v20  ;;  %v87_v25 = vmul.f32 %v3859_v21, %v3859_v21 }
  0x9b   :  { %v91_v26 = vsel %vm62_vm0, %v85_v24, 0.0  ;;  %v97_v27 = vsel %vm62_vm0, %v87_v25, 0.0 }
  0x9c   :  { %95 = vadd.xlane.f32.xlu0 %v94_v23  ;;  %92 = vadd.xlane.f32.xlu1 %v91_v26 }
  0xa0   :  { %98 = vadd.xlane.f32.xlu1 %v97_v27 }
  0xb1   :  { %252 = vrot.lane.b32.xlu1 %v3903_v38, %s3802_s30 }
  0xb2   :  { %244 = vrot.lane.b32.xlu0 %v3908_v39, %s3802_s30 }
  0xb5   :  { %260 = vrot.lane.b32.xlu1 %v3915_v40, %s3802_s30 }
  0xb9   :  { %268 = vrot.lane.b32.xlu1 %v3920_v41, %s3802_s30 }
 0x125   :  { %v90_v42 = vpop.xlane.xlu0 %89 }
 0x126   :  { %v100_v43 = vmul.f32 0.03125, %v90_v42 }
 0x128   :  { %v104_v44 = vadd.f32 1e-12, %v100_v43 }
 0x129   :  { %v93_v45 = vpop.xlane.xlu1 %92  ;;  %v96_v46 = vpop.xlane.xlu0 %95 }
 0x12a   :  { %3681 = vrsqrt.f32 %v104_v44  ;;  %v101_v47 = vmul.f32 0.03125, %v93_v45  ;;  %v102_v48 = vmul.f32 0.03125, %v96_v46 }
 0x12c   :  { %v105_v49 = vadd.f32 1e-12, %v101_v47  ;;  %v106_v50 = vadd.f32 1e-12, %v102_v48 }
 0x12d   :  { %v99_v51 = vpop.xlane.xlu1 %98  ;;  %v3966_v14 = vpop.permute.xlu0 %244 }
 0x12e   :  { %3683 = vrsqrt.f32 %v105_v49  ;;  %v103_v52 = vmul.f32 0.03125, %v99_v51 }
 0x12f   :  { %3685 = vrsqrt.f32 %v106_v50 }
 0x130   :  { %v107_v53 = vadd.f32 1e-12, %v103_v52 }
 0x132   :  { %3687 = vrsqrt.f32 %v107_v53 }
 0x134   :  { %v3682_v54 = vpop.eup %3681 }
 0x135   :  { %v112_v56 = vmul.f32 %v3682_v54, %v3849_v12  ;;  %v3964_v12 = vpop.permute.xlu1 %252 }
 0x137   :  { %v120_v58 = vmul.f32 %v2529_v55, %v112_v56 }
 0x138   :  { %v3684_v59 = vpop.eup %3683 }
 0x139   :  { %v3686_v60 = vpop.eup %3685  ;;  %v3931_v61 = vadd.f32 %v2530_v57, %v120_v58  ;;  %v113_v62 = vmul.f32 %v3684_v59, %v3857_v20  ;;  %v3976_v19 = vpop.permute.xlu1 %260 }
 0x13a   :  { %v114_v63 = vmul.f32 %v3686_v60, %v3851_v13 }
 0x13b   :  { %2824 = vmatprep.mubr.msk.f32.mxu0 %vm62_vm0, %v3931_v61  ;;  %v121_v0 = vmul.f32 %v2529_v55, %v113_v62 }
 0x13c   :  { %v3688_v1 = vpop.eup %3687  ;;  %v122_v2 = vmul.f32 %v2529_v55, %v114_v63  ;;  %v3774_v63 = vld [vmem:[%s4701_s1] sm:$0xff] }
 0x13d   :  { %v3937_v3 = vadd.f32 %v2530_v57, %v121_v0  ;;  %v115_v4 = vmul.f32 %v3688_v1, %v3859_v21  ;;  %v4001_v43 = vpop.permute.xlu1 %268 }
 0x13e   :  { %v3940_v5 = vadd.f32 %v2530_v57, %v122_v2 }
 0x13f   :  { %2825 = vmatmul.mubr.msk.f32.vlgmr.msra.gmra.mrb[0].mxu0 %vm62_vm0, %v3937_v3  ;;  %v123_v6 = vmul.f32 %v2529_v55, %v115_v4 }
 0x140   :  { %2827 = vmatprep.mubr.msk.f32.mxu0 %vm62_vm0, %v3940_v5 }
 0x141   :  { %v3946_v7 = vadd.f32 %v2530_v57, %v123_v6 }
 0x143   :  { %2828 = vmatmul.mubr.msk.f32.gmra.mrb[2].mxu0 %vm62_vm0, %v3946_v7 }
 0x212   :  { %v2826_v13 = vpop.f32.mrb[0].mxu0 }
 0x213   :  { %v3969_v15 = vadd.f32 %v2826_v13, %v3962_v11  ;;  %v224_v16 = vpop.f32.mrb[1].mxu0 }
 0x214   :  { %v3972_v17 = vadd.f32 %v224_v16, %v3962_v11 }
 0x215   :  { %v248_v18 = vmul.f32 %v3966_v14, %v3969_v15  ;;  %v256_v27 = vmul.f32 %v3964_v12, %v3969_v15  ;;  %v264_v42 = vmul.f32 %v3976_v19, %v3969_v15  ;;  %v272_v49 = vmul.f32 %v4001_v43, %v3969_v15 }
 0x216   :  { %v2829_v20 = vpop.f32.mrb[2].mxu0  ;;  %2862 = vmatprep.mubr.msk.f32.mxu1 %vm62_vm0, %v3972_v17  ;;  %v247_v21 = vmul.f32 %v3966_v14, %v3972_v17  ;;  %v255_v26 = vmul.f32 %v3964_v12, %v3972_v17  ;;  %v263_v35 = vmul.f32 %v3976_v19, %v3972_v17  ;;  %v271_v48 = vmul.f32 %v4001_v43, %v3972_v17 }
 0x217   :  { %v3983_v22 = vadd.f32 %v2829_v20, %v3962_v11  ;;  %v234_v23 = vpop.f32.mrb[3].mxu0 }
 0x218   :  { %v3986_v24 = vadd.f32 %v234_v23, %v3962_v11  ;;  %v3481_v25 = vpack.i.bf16 %v248_v18, %v247_v21  ;;  %v3491_v45 = vpack.i.bf16 %v256_v27, %v255_v26  ;;  %v3501_v51 = vpack.i.bf16 %v264_v42, %v263_v35 }
 0x219   :  { %v250_v32 = vmul.f32 %v3966_v14, %v3983_v22  ;;  %v258_v47 = vmul.f32 %v3964_v12, %v3983_v22  ;;  %v266_v53 = vmul.f32 %v3976_v19, %v3983_v22  ;;  %v3511_v55 = vpack.i.bf16 %v272_v49, %v271_v48 }
 0x21a   :  { %3482 = vrot.lane.b32.xlu0 %v3481_v25, %s3803_s11  ;;  %v249_v34 = vmul.f32 %v3966_v14, %v3986_v24  ;;  %v257_v46 = vmul.f32 %v3964_v12, %v3986_v24  ;;  %v265_v52 = vmul.f32 %v3976_v19, %v3986_v24  ;;  %v273_v56 = vmul.f32 %v4001_v43, %v3986_v24 }
 0x21b   :  { %v274_v57 = vmul.f32 %v4001_v43, %v3983_v22 }
 0x21c   :  { %v3486_v44 = vpack.i.bf16 %v250_v32, %v249_v34  ;;  %v3496_v50 = vpack.i.bf16 %v258_v47, %v257_v46  ;;  %v3506_v54 = vpack.i.bf16 %v266_v53, %v265_v52 }
 0x21d   :  { %v3516_v58 = vpack.i.bf16 %v274_v57, %v273_v56  ;;  %v23_v56 = vld [vmem:[%s4701_s1 + $0x28] sm:$0xff]  ;;  %v24_v57 = vld [vmem:[%s4701_s1 + $0x30] sm:$0xff] }
 0x21e   :  { %3487 = vrot.lane.b32.xlu1 %v3486_v44, %s3803_s11  ;;  %3492 = vrot.lane.b32.xlu0 %v3491_v45, %s3803_s11 }
 0x222   :  { %3497 = vrot.lane.b32.xlu1 %v3496_v50, %s3803_s11  ;;  %3502 = vrot.lane.b32.xlu0 %v3501_v51, %s3803_s11 }
 0x226   :  { %3507 = vrot.lane.b32.xlu1 %v3506_v54, %s3803_s11  ;;  %3512 = vrot.lane.b32.xlu0 %v3511_v55, %s3803_s11  ;;  %v22_v55 = vld [vmem:[%s4701_s1 + $0x20] sm:$0xff] }
 0x22a   :  { %3517 = vrot.lane.b32.xlu1 %v3516_v58, %s3803_s11  ;;  %v4079_v58 = vpack.c.bf16 %v23_v56, %v22_v55 }
 0x22c   :  { %3229 = vmatprep.subr.bf16.mxu0 %v4079_v58 }
 0x22d   :  { %3231 = vmatpush3.bf16.msra.mxu0 %v4079_v58 }
 0x28c   :  { %v3483_v59 = vpop.permute.xlu0 %3482 }
 0x28d   :  { %v3485_v60 = vunpack.i.h.bf16 %v3483_v59  ;;  %v3484_v62 = vunpack.i.l.bf16 %v3483_v59  ;;  %v25_v59 = vld [vmem:[%s4701_s1 + $0x38] sm:$0xff] }
 0x28f   :  { %v3180_v0 = vpack.c.bf16 %v3485_v60, %v3484_v62  ;;  %v4084_v60 = vpack.c.bf16 %v25_v59, %v24_v57  ;;  %v26_v62 = vld [vmem:[%s4701_s1 + $0x40] sm:$0xff] }
 0x290   :  { %v3488_v1 = vpop.permute.xlu1 %3487  ;;  %v3493_v6 = vpop.permute.xlu0 %3492 }
 0x291   :  { %v3490_v2 = vunpack.i.h.bf16 %v3488_v1  ;;  %v3489_v4 = vunpack.i.l.bf16 %v3488_v1  ;;  %3182 = vmatprep.subr.msk.bf16.mxu1 %vm4028_vm11, %v3180_v0  ;;  %v3495_v16 = vunpack.i.h.bf16 %v3493_v6  ;;  %v3494_v18 = vunpack.i.l.bf16 %v3493_v6  ;;  %3233 = vmatprep.subr.bf16.mxu0 %v4084_v60 }
 0x292   :  { %3185 = vmatpush3.bf16.xpose.msk.msra.mxu1 %vm4028_vm11, %v3180_v0  ;;  %v27_v0 = vld [vmem:[%s4701_s1 + $0x48] sm:$0xff]  ;;  %3235 = vmatpush3.bf16.msra.mxu0 %v4084_v60 }
 0x293   :  { %v3186_v13 = vpack.c.bf16 %v3490_v2, %v3489_v4  ;;  %v3192_v20 = vpack.c.bf16 %v3495_v16, %v3494_v18  ;;  %v4095_v1 = vpack.c.bf16 %v27_v0, %v26_v62  ;;  %v28_v2 = vld [vmem:[%s4701_s1 + $0x50] sm:$0xff]  ;;  %v29_v4 = vld [vmem:[%s4701_s1 + $0x58] sm:$0xff]  ;;  %v18_v16 = vld [vmem:[%s4701_s1] sm:$0xff] }
 0x294   :  { %v3498_v21 = vpop.permute.xlu1 %3497  ;;  %v3503_v27 = vpop.permute.xlu0 %3502  ;;  %v4105_v6 = vpack.c.bf16 %v29_v4, %v28_v2 }
 0x295   :  { %3188 = vmatprep.subr.msk.bf16.mxu1 %vm4028_vm11, %v3186_v13  ;;  %v3500_v23 = vunpack.i.h.bf16 %v3498_v21  ;;  %v3499_v25 = vunpack.i.l.bf16 %v3498_v21  ;;  %v3505_v32 = vunpack.i.h.bf16 %v3503_v27  ;;  %v3504_v34 = vunpack.i.l.bf16 %v3503_v27  ;;  %3237 = vmatprep.subr.bf16.mxu0 %v4095_v1 }
 0x296   :  { %3239 = vmatpush3.bf16.msra.mxu0 %v4095_v1 }
 0x297   :  { %v3198_v26 = vpack.c.bf16 %v3500_v23, %v3499_v25  ;;  %v3204_v35 = vpack.c.bf16 %v3505_v32, %v3504_v34  ;;  %3241 = vmatprep.subr.bf16.mxu0 %v4105_v6  ;;  %v20_v25 = vld [vmem:[%s4701_s1 + $0x10] sm:$0xff]  ;;  %v21_v34 = vld [vmem:[%s4701_s1 + $0x18] sm:$0xff] }
 0x298   :  { %v3508_v42 = vpop.permute.xlu1 %3507  ;;  %v3513_v47 = vpop.permute.xlu0 %3512 }
 0x299   :  { %v3510_v44 = vunpack.i.h.bf16 %v3508_v42  ;;  %v3509_v45 = vunpack.i.l.bf16 %v3508_v42  ;;  %v3515_v48 = vunpack.i.h.bf16 %v3513_v47  ;;  %v3514_v49 = vunpack.i.l.bf16 %v3513_v47  ;;  %v30_v42 = vld [vmem:[%s4701_s1 + $0x60] sm:$0xff]  ;;  %v33_v47 = vld [vmem:[%s4701_s1 + $0x78] sm:$0xff] }
 0x29a   :  { %3191 = vmatpush3.bf16.xpose.msk.msra.mxu1 %vm4028_vm11, %v3186_v13  ;;  %3243 = vmatpush3.bf16.msra.mxu0 %v4105_v6  ;;  %v19_v13 = vld [vmem:[%s4701_s1 + $0x8] sm:$0xff] }
 0x29b   :  { %3194 = vmatprep.subr.msk.bf16.mxu1 %vm4028_vm11, %v3192_v20  ;;  %v3210_v46 = vpack.c.bf16 %v3510_v44, %v3509_v45  ;;  %v3216_v50 = vpack.c.bf16 %v3515_v48, %v3514_v49  ;;  %v31_v44 = vld [vmem:[%s4701_s1 + $0x68] sm:$0xff] }
 0x29c   :  { %v3518_v51 = vpop.permute.xlu1 %3517  ;;  %v4128_v45 = vpack.c.bf16 %v31_v44, %v30_v42  ;;  %v35_v49 = vld [vmem:[%s4701_s1 + $0x88] sm:$0xff] }
 0x29d   :  { %v3520_v52 = vunpack.i.h.bf16 %v3518_v51  ;;  %v3519_v53 = vunpack.i.l.bf16 %v3518_v51  ;;  %v37_v51 = vld [vmem:[%s4701_s1 + $0x98] sm:$0xff] }
 0x29e   :  { %3245 = vmatprep.subr.bf16.mxu0 %v4128_v45 }
 0x29f   :  { %v3222_v54 = vpack.c.bf16 %v3520_v52, %v3519_v53  ;;  %3247 = vmatpush3.bf16.msra.mxu0 %v4128_v45 }
 0x2a2   :  { %3197 = vmatpush3.bf16.xpose.msk.msra.mxu1 %vm4028_vm11, %v3192_v20 }
 0x2a3   :  { %3200 = vmatprep.subr.msk.bf16.mxu1 %vm4028_vm11, %v3198_v26 }
 0x2aa   :  { %3203 = vmatpush3.bf16.xpose.msk.msra.mxu1 %vm4028_vm11, %v3198_v26 }
 0x2ab   :  { %3206 = vmatprep.subr.msk.bf16.mxu1 %vm4028_vm11, %v3204_v35 }
 0x2b2   :  { %3209 = vmatpush3.bf16.xpose.msk.msra.mxu1 %vm4028_vm11, %v3204_v35 }
 0x2b3   :  { %3212 = vmatprep.subr.msk.bf16.mxu1 %vm4028_vm11, %v3210_v46 }
 0x2ba   :  { %3215 = vmatpush3.bf16.xpose.msk.msra.mxu1 %vm4028_vm11, %v3210_v46  ;;  %v32_v46 = vld [vmem:[%s4701_s1 + $0x70] sm:$0xff] }
 0x2bb   :  { %3218 = vmatprep.subr.msk.bf16.mxu1 %vm4028_vm11, %v3216_v50  ;;  %v4140_v48 = vpack.c.bf16 %v33_v47, %v32_v46 }
 0x2bd   :  { %3249 = vmatprep.subr.bf16.mxu0 %v4140_v48 }
 0x2be   :  { %3251 = vmatpush3.bf16.msra.mxu0 %v4140_v48 }
 0x2c2   :  { %3221 = vmatpush3.bf16.xpose.msk.msra.mxu1 %vm4028_vm11, %v3216_v50 }
 0x2c3   :  { %3224 = vmatprep.subr.msk.bf16.mxu1 %vm4028_vm11, %v3222_v54 }
 0x2ca   :  { %3227 = vmatpush3.bf16.xpose.msk.msra.mxu1 %vm4028_vm11, %v3222_v54 }
 0x2d1   :  { %2863 = vmatmul.mubr.msk.f32.vlgmr.msra.gmra.mrb[0].mxu1 %vm62_vm0, %v3969_v15 }
 0x2d2   :  { %2865 = vmatprep.mubr.msk.f32.mxu1 %vm62_vm0, %v3986_v24 }
 0x2d5   :  { %2866 = vmatmul.mubr.msk.f32.gmra.mrb[2].mxu1 %vm62_vm0, %v3983_v22 }
 0x3a4   :  { %v2864_v18 = vpop.f32.mrb[0].mxu1 }
 0x3a5   :  { %v467_v20 = vadd.f32 %v2864_v18, %v19_v13  ;;  %v461_v21 = vpop.f32.mrb[1].mxu1 }
 0x3a6   :  { %v462_v23 = vadd.f32 %v461_v21, %v18_v16 }
 0x3a7   :  { %482 = vmax.xlane.f32.xlu1 %v467_v20 }
 0x3a8   :  { %v2867_v26 = vpop.f32.mrb[2].mxu1  ;;  %480 = vmax.xlane.f32.xlu0 %v462_v23 }
 0x3a9   :  { %v471_v27 = vpop.f32.mrb[3].mxu1  ;;  %v477_v35 = vadd.f32 %v2867_v26, %v21_v34 }
 0x3aa   :  { %v472_v32 = vadd.f32 %v471_v27, %v20_v25 }
 0x3ac   :  { %484 = vmax.xlane.f32.xlu0 %v472_v32 }
 0x3b0   :  { %486 = vmax.xlane.f32.xlu0 %v477_v35 }
 0x3b8   :  { %282 = vrot.lane.b32.xlu1 %v3903_v38, %s3804_s15  ;;  %v34_v38 = vld [vmem:[%s4701_s1 + $0x80] sm:$0xff] }
 0x3b9   :  { %v4152_v50 = vpack.c.bf16 %v35_v49, %v34_v38 }
 0x3bb   :  { %3253 = vmatprep.subr.bf16.mxu0 %v4152_v50 }
 0x3bc   :  { %289 = vrot.lane.b32.xlu1 %v3915_v40, %s3804_s15  ;;  %3255 = vmatpush3.bf16.msra.mxu0 %v4152_v50  ;;  %v36_v40 = vld [vmem:[%s4701_s1 + $0x90] sm:$0xff] }
 0x3bd   :  { %v4164_v52 = vpack.c.bf16 %v37_v51, %v36_v40 }
 0x3bf   :  { %3257 = vmatprep.subr.bf16.mxu0 %v4164_v52 }
 0x3c0   :  { %296 = vrot.lane.b32.xlu1 %v3920_v41, %s3804_s15  ;;  %3259 = vmatpush3.bf16.msra.mxu0 %v4164_v52 }
 0x3c6   :  { %275 = vrot.lane.b32.xlu0 %v3908_v39, %s3804_s15 }
 0x434   :  { %v483_v41 = vpop.xlane.xlu1 %482 }
 0x435   :  { %v489_v53 = vsub.f32 %v467_v20, %v483_v41  ;;  %v481_v54 = vpop.xlane.xlu0 %480 }
 0x436   :  { %v488_v55 = vsub.f32 %v462_v23, %v481_v54 }
 0x437   :  { %v494_v56 = vmul.f32 1.442695, %v489_v53 }
 0x438   :  { %v492_v57 = vmul.f32 1.442695, %v488_v55  ;;  %v4170_v2 = vpop.permute.xlu1 %282 }
 0x439   :  { %v485_v59 = vpop.xlane.xlu0 %484  ;;  %v286_v34 = vmul.f32 %v4170_v2, %v3969_v15  ;;  %v287_v44 = vmul.f32 %v4170_v2, %v3986_v24  ;;  %v288_v46 = vmul.f32 %v4170_v2, %v3983_v22 }
 0x43a   :  { %3689 = vpow2.f32 %v492_v57  ;;  %v490_v62 = vsub.f32 %v472_v32, %v485_v59  ;;  %v285_v32 = vmul.f32 %v4170_v2, %v3972_v17 }
 0x43b   :  { %3691 = vpow2.f32 %v494_v56  ;;  %v3536_v41 = vpack.i.bf16 %v288_v46, %v287_v44 }
 0x43c   :  { %v496_v0 = vmul.f32 1.442695, %v490_v62  ;;  %v4180_v23 = vpop.permute.xlu1 %289  ;;  %v3531_v38 = vpack.i.bf16 %v286_v34, %v285_v32 }
 0x43d   :  { %v487_v4 = vpop.xlane.xlu0 %486  ;;  %v292_v49 = vmul.f32 %v4180_v23, %v3972_v17  ;;  %v293_v40 = vmul.f32 %v4180_v23, %v3969_v15  ;;  %v294_v53 = vmul.f32 %v4180_v23, %v3986_v24  ;;  %v295_v54 = vmul.f32 %v4180_v23, %v3983_v22 }
 0x43e   :  { %3693 = vpow2.f32 %v496_v0  ;;  %v491_v13 = vsub.f32 %v477_v35, %v487_v4 }
 0x43f   :  { %v3541_v56 = vpack.i.bf16 %v293_v40, %v292_v49  ;;  %v3546_v62 = vpack.i.bf16 %v295_v54, %v294_v53 }
 0x440   :  { %v498_v16 = vmul.f32 1.442695, %v491_v13  ;;  %v4206_v51 = vpop.permute.xlu1 %296 }
 0x441   :  { %v4172_v18 = vpop.permute.xlu0 %275  ;;  %v299_v57 = vmul.f32 %v4206_v51, %v3972_v17  ;;  %v300_v59 = vmul.f32 %v4206_v51, %v3969_v15  ;;  %v301_v0 = vmul.f32 %v4206_v51, %v3986_v24  ;;  %v302_v4 = vmul.f32 %v4206_v51, %v3983_v22 }
 0x442   :  { %3695 = vpow2.f32 %v498_v16  ;;  %v278_v39 = vmul.f32 %v4172_v18, %v3972_v17  ;;  %v279_v20 = vmul.f32 %v4172_v18, %v3969_v15  ;;  %v280_v21 = vmul.f32 %v4172_v18, %v3986_v24 }
 0x443   :  { %v281_v25 = vmul.f32 %v4172_v18, %v3983_v22  ;;  %v3551_v13 = vpack.i.bf16 %v300_v59, %v299_v57  ;;  %v3556_v16 = vpack.i.bf16 %v302_v4, %v301_v0  ;;  %v3566_v15 = vpack.i.bf16 %v3891_v33, %v3882_v30 }
 0x444   :  { %v4184_v26 = vpop.eup %3689  ;;  %v3521_v27 = vpack.i.bf16 %v279_v20, %v278_v39 }
 0x445   :  { %v4190_v35 = vpop.eup %3691  ;;  %2900 = vmatprep.mubr.f32.mxu0 %v4184_v26  ;;  %v3526_v42 = vpack.i.bf16 %v281_v25, %v280_v21 }
 0x446   :  { %3522 = vrot.lane.b32.xlu0 %v3521_v27, %s3804_s15  ;;  %2901 = vmatmul.mubr.f32.vlgmr.msra.gmra.mrb[4].mxu0 %v4190_v35 }
 0x447   :  { %3527 = vrot.lane.b32.xlu1 %v3526_v42, %s3804_s15 }
 0x448   :  { %v4200_v47 = vpop.eup %3693 }
 0x449   :  { %2903 = vmatprep.mubr.f32.mxu0 %v4200_v47 }
 0x44a   :  { %3532 = vrot.lane.b32.xlu0 %v3531_v38, %s3804_s15 }
 0x44b   :  { %3537 = vrot.lane.b32.xlu1 %v3536_v41, %s3804_s15 }
 0x44c   :  { %v4215_v55 = vpop.eup %3695 }
 0x44d   :  { %2904 = vmatmul.mubr.f32.gmra.mrb[6].mxu0 %v4215_v55 }
 0x44e   :  { %3542 = vrot.lane.b32.xlu0 %v3541_v56, %s3804_s15 }
 0x44f   :  { %3547 = vrot.lane.b32.xlu1 %v3546_v62, %s3804_s15 }
 0x452   :  { %3552 = vrot.lane.b32.xlu0 %v3551_v13, %s3804_s15 }
 0x453   :  { %3557 = vrot.lane.b32.xlu1 %v3556_v16, %s3804_s15 }
 0x456   :  { %3562 = vrot.lane.b32.xlu0 %v3561_v31, %s3802_s30 }
 0x457   :  { %3567 = vrot.lane.b32.xlu1 %v3566_v15, %s3802_s30 }
 0x45a   :  { %759 = vrot.lane.b32.xlu0 %v3962_v11, %s3802_s30 }
 0x4b8   :  { %v3523_v17 = vpop.permute.xlu0 %3522 }
 0x4b9   :  { %v3525_v22 = vunpack.i.h.bf16 %v3523_v17  ;;  %v3524_v24 = vunpack.i.l.bf16 %v3523_v17  ;;  %v3528_v39 = vpop.permute.xlu1 %3527 }
 0x4ba   :  { %v3530_v20 = vunpack.i.h.bf16 %v3528_v39  ;;  %v3529_v21 = vunpack.i.l.bf16 %v3528_v39 }
 0x4bb   :  { %v3260_v25 = vpack.c.bf16 %v3525_v22, %v3524_v24 }
 0x4bc   :  { %v3533_v27 = vpop.permute.xlu0 %3532  ;;  %v3264_v32 = vpack.c.bf16 %v3530_v20, %v3529_v21 }
 0x4bd   :  { %v3535_v34 = vunpack.i.h.bf16 %v3533_v27  ;;  %v3534_v28 = vunpack.i.l.bf16 %v3533_v27  ;;  %3261 = vmatprep.subr.bf16.mxu0 %v3260_v25  ;;  %v3538_v29 = vpop.permute.xlu1 %3537 }
 0x4be   :  { %3263 = vmatpush3.bf16.msra.mxu0 %v3260_v25  ;;  %v3540_v30 = vunpack.i.h.bf16 %v3538_v29  ;;  %v3539_v33 = vunpack.i.l.bf16 %v3538_v29 }
 0x4bf   :  { %3265 = vmatprep.subr.bf16.mxu0 %v3264_v32  ;;  %v3268_v11 = vpack.c.bf16 %v3535_v34, %v3534_v28 }
 0x4c0   :  { %v3543_v31 = vpop.permute.xlu0 %3542  ;;  %v3272_v44 = vpack.c.bf16 %v3540_v30, %v3539_v33 }
 0x4c1   :  { %v3545_v46 = vunpack.i.h.bf16 %v3543_v31  ;;  %v3544_v38 = vunpack.i.l.bf16 %v3543_v31  ;;  %v3548_v49 = vpop.permute.xlu1 %3547 }
 0x4c2   :  { %3267 = vmatpush3.bf16.msra.mxu0 %v3264_v32  ;;  %v3550_v40 = vunpack.i.h.bf16 %v3548_v49  ;;  %v3549_v54 = vunpack.i.l.bf16 %v3548_v49 }
 0x4c3   :  { %3269 = vmatprep.subr.bf16.mxu0 %v3268_v11  ;;  %v3276_v53 = vpack.c.bf16 %v3545_v46, %v3544_v38 }
 0x4c4   :  { %v3553_v42 = vpop.permute.xlu0 %3552  ;;  %v3280_v62 = vpack.c.bf16 %v3550_v40, %v3549_v54 }
 0x4c5   :  { %v3555_v0 = vunpack.i.h.bf16 %v3553_v42  ;;  %v3554_v4 = vunpack.i.l.bf16 %v3553_v42  ;;  %v3558_v13 = vpop.permute.xlu1 %3557 }
 0x4c6   :  { %3271 = vmatpush3.bf16.msra.mxu0 %v3268_v11  ;;  %v3560_v15 = vunpack.i.h.bf16 %v3558_v13  ;;  %v3559_v17 = vunpack.i.l.bf16 %v3558_v13 }
 0x4c7   :  { %3273 = vmatprep.subr.bf16.mxu0 %v3272_v44  ;;  %v3284_v16 = vpack.c.bf16 %v3555_v0, %v3554_v4 }
 0x4c8   :  { %v3563_v41 = vpop.permute.xlu0 %3562  ;;  %v3288_v22 = vpack.c.bf16 %v3560_v15, %v3559_v17 }
 0x4c9   :  { %v3565_v56 = vunpack.i.h.bf16 %v3563_v41  ;;  %v3564_v57 = vunpack.i.l.bf16 %v3563_v41  ;;  %v3568_v27 = vpop.permute.xlu1 %3567 }
 0x4ca   :  { %3275 = vmatpush3.bf16.msra.mxu0 %v3272_v44  ;;  %v3570_v34 = vunpack.i.h.bf16 %v3568_v27  ;;  %v3569_v28 = vunpack.i.l.bf16 %v3568_v27 }
 0x4cb   :  { %3277 = vmatprep.subr.bf16.mxu0 %v3276_v53  ;;  %v3292_v59 = vpack.c.bf16 %v3565_v56, %v3564_v57 }
 0x4cc   :  { %v3296_v11 = vpack.c.bf16 %v3570_v34, %v3569_v28  ;;  %v760_v49 = vpop.permute.xlu0 %759 }
 0x4cd   :  { %3293 = vmatprep.subr.bf16.mxu1 %v3292_v59 }
 0x4ce   :  { %3279 = vmatpush3.bf16.msra.mxu0 %v3276_v53  ;;  %3295 = vmatpush3.bf16.msra.mxu1 %v3292_v59 }
 0x4cf   :  { %3281 = vmatprep.subr.bf16.mxu0 %v3280_v62  ;;  %3297 = vmatprep.subr.bf16.mxu1 %v3296_v11 }
 0x4d2   :  { %3283 = vmatpush3.bf16.msra.mxu0 %v3280_v62  ;;  %3299 = vmatpush3.bf16.msra.mxu1 %v3296_v11 }
 0x4d3   :  { %3285 = vmatprep.subr.bf16.mxu0 %v3284_v16 }
 0x4d6   :  { %3287 = vmatpush3.bf16.msra.mxu0 %v3284_v16 }
 0x4d7   :  { %3289 = vmatprep.subr.bf16.mxu0 %v3288_v22 }
 0x4da   :  { %3291 = vmatpush3.bf16.msra.mxu0 %v3288_v22 }
 0x519   :  { %v2902_v24 = vpop.f32.mrb[4].mxu0 }
 0x51a   :  { %3697 = vrcp.f32 %v2902_v24  ;;  %v566_v39 = vpop.f32.mrb[5].mxu0 }
 0x51b   :  { %3699 = vrcp.f32 %v566_v39 }
 0x520   :  { %v2905_v20 = vpop.f32.mrb[6].mxu0 }
 0x521   :  { %3701 = vrcp.f32 %v2905_v20  ;;  %v576_v21 = vpop.f32.mrb[7].mxu0 }
 0x522   :  { %3703 = vrcp.f32 %v576_v21 }
 0x524   :  { %v3698_v25 = vpop.eup %3697 }
 0x525   :  { %v3700_v32 = vpop.eup %3699  ;;  %v590_v31 = vmul.f32 %v3698_v25, %v4190_v35 }
 0x526   :  { %v589_v29 = vmul.f32 %v3700_v32, %v4184_v26 }
 0x528   :  { %2938 = vmatprep.mubr.f32.mxu0 %v589_v29 }
 0x529   :  { %2939 = vmatmul.mubr.f32.vlgmr.msra.gmra.mrb[8].mxu0 %v590_v31 }
 0x52b   :  { %v3702_v30 = vpop.eup %3701 }
 0x52c   :  { %v3704_v33 = vpop.eup %3703  ;;  %v592_v44 = vmul.f32 %v3702_v30, %v4215_v55 }
 0x52d   :  { %v591_v42 = vmul.f32 %v3704_v33, %v4200_v47 }
 0x52f   :  { %2941 = vmatprep.mubr.f32.mxu0 %v591_v42 }
 0x530   :  { %2942 = vmatmul.mubr.f32.gmra.mrb[10].mxu0 %v592_v44  ;;  %v917_v44 = vsub.s32 1, %v3950_v8 }
 0x5fc   :  { %v2940_v46 = vpop.f32.mrb[8].mxu0 }
 0x5fd   :  { %v723_v38 = vpop.f32.mrb[9].mxu0 }
 0x5fe   :  { %2952 = vmatprep.mubr.msk.f32.mxu1 %vm62_vm0, %v723_v38  ;;  %v133_v38 = vld [vmem:[%s4702_s2 + $0x8] sm:$0xff] }
 0x5ff   :  { %2953 = vmatmul.mubr.msk.f32.vlgmr.msra.gmra.mrb[4].mxu1 %vm62_vm0, %v2940_v46  ;;  %v4263_v46 = vrot.slane %v3958_v10, %v917_v44  ;;  %v139_v10 = vld [vmem:[%s4702_s2 + $0x38] sm:$0xff] }
 0x603   :  { %v2943_v26 = vpop.f32.mrb[10].mxu0 }
 0x604   :  { %v733_v35 = vpop.f32.mrb[11].mxu0 }
 0x605   :  { %2955 = vmatprep.mubr.msk.f32.mxu1 %vm62_vm0, %v733_v35 }
 0x606   :  { %2956 = vmatmul.mubr.msk.f32.gmra.mrb[6].mxu1 %vm62_vm0, %v2943_v26  ;;  %v135_v26 = vld [vmem:[%s4702_s2 + $0x18] sm:$0xff] }
 0x607   :  { %v3300_v35 = vpack.c.bf16 %v135_v26, %v133_v38 }
 0x609   :  { %3301 = vmatprep.subr.bf16.mxu0 %v3300_v35 }
 0x60a   :  { %3303 = vmatpush3.bf16.msra.mxu0 %v3300_v35 }
 0x6d2   :  { %v2954_v40 = vpop.f32.mrb[4].mxu1 }
 0x6d3   :  { %v846_v41 = vadd.f32 %v2954_v40, %v760_v49  ;;  %v840_v47 = vpop.f32.mrb[5].mxu1 }
 0x6d4   :  { %v841_v53 = vadd.f32 %v840_v47, %v760_v49 }
 0x6d5   :  { %v860_v55 = vadd.f32 %v846_v41, %v3937_v3  ;;  %v3571_v41 = vpack.i.bf16 %v135_v26, %v133_v38 }
 0x6d6   :  { %v859_v54 = vadd.f32 %v841_v53, %v3931_v61  ;;  %v141_v53 = vld [vmem:[%s4702_s2 + $0x48] sm:$0x3] }
 0x6d7   :  { %v866_v56 = vsel %vm62_vm0, %v860_v55, 0.0 }
 0x6d8   :  { %867 = vadd.xlane.f32.xlu0 %v866_v56  ;;  %v863_v57 = vsel %vm62_vm0, %v859_v54, 0.0 }
 0x6d9   :  { %864 = vadd.xlane.f32.xlu1 %v863_v57  ;;  %v2957_v59 = vpop.f32.mrb[6].mxu1 }
 0x6da   :  { %v850_v62 = vpop.f32.mrb[7].mxu1  ;;  %v856_v0 = vadd.f32 %v2957_v59, %v760_v49 }
 0x6db   :  { %v851_v4 = vadd.f32 %v850_v62, %v760_v49  ;;  %v137_v49 = vld [vmem:[%s4702_s2 + $0x28] sm:$0xff] }
 0x6dc   :  { %v862_v15 = vadd.f32 %v856_v0, %v3946_v7  ;;  %v3304_v40 = vpack.c.bf16 %v139_v10, %v137_v49  ;;  %v3576_v47 = vpack.i.bf16 %v139_v10, %v137_v49 }
 0x6dd   :  { %v861_v13 = vadd.f32 %v851_v4, %v3940_v5 }
 0x6de   :  { %v872_v3 = vsel %vm62_vm0, %v862_v15, 0.0  ;;  %3305 = vmatprep.subr.bf16.mxu0 %v3304_v40 }
 0x6df   :  { %v869_v16 = vsel %vm62_vm0, %v861_v13, 0.0  ;;  %3307 = vmatpush3.bf16.msra.mxu0 %v3304_v40 }
 0x6e0   :  { %870 = vadd.xlane.f32.xlu0 %v869_v16 }
 0x6e4   :  { %873 = vadd.xlane.f32.xlu0 %v872_v3 }
 0x765   :  { %v868_v61 = vpop.xlane.xlu0 %867 }
 0x766   :  { %v876_v17 = vmul.f32 0.03125, %v868_v61  ;;  %v865_v22 = vpop.xlane.xlu1 %864 }
 0x767   :  { %v875_v24 = vmul.f32 0.03125, %v865_v22 }
 0x768   :  { %v880_v39 = vsub.f32 %v860_v55, %v876_v17  ;;  %v4285_v55 = vrot.slane %v141_v53, %v3953_v9 }
 0x769   :  { %v879_v20 = vsub.f32 %v859_v54, %v875_v24 }
 0x76a   :  { %v884_v21 = vmul.f32 %v880_v39, %v880_v39 }
 0x76b   :  { %v883_v25 = vmul.f32 %v879_v20, %v879_v20 }
 0x76c   :  { %v890_v27 = vsel %vm62_vm0, %v884_v21, 0.0 }
 0x76d   :  { %891 = vadd.xlane.f32.xlu0 %v890_v27  ;;  %v871_v5 = vpop.xlane.xlu0 %870  ;;  %v887_v32 = vsel %vm62_vm0, %v883_v25, 0.0 }
 0x76e   :  { %v877_v34 = vmul.f32 0.03125, %v871_v5  ;;  %888 = vadd.xlane.f32.xlu1 %v887_v32 }
 0x770   :  { %v881_v7 = vsub.f32 %v861_v13, %v877_v34 }
 0x771   :  { %v874_v28 = vpop.xlane.xlu0 %873 }
 0x772   :  { %v878_v29 = vmul.f32 0.03125, %v874_v28  ;;  %v885_v31 = vmul.f32 %v881_v7, %v881_v7 }
 0x774   :  { %v882_v11 = vsub.f32 %v862_v15, %v878_v29  ;;  %v893_v30 = vsel %vm62_vm0, %v885_v31, 0.0 }
 0x775   :  { %894 = vadd.xlane.f32.xlu1 %v893_v30 }
 0x776   :  { %v886_v33 = vmul.f32 %v882_v11, %v882_v11 }
 0x778   :  { %v896_v42 = vsel %vm62_vm0, %v886_v33, 0.0 }
 0x779   :  { %897 = vadd.xlane.f32.xlu0 %v896_v42 }
 0x786   :  { %924 = vrot.lane.b32.xlu1 %v4263_v46, %s3803_s11 }
 0x78a   :  { %3577 = vrot.lane.b32.xlu1 %v3576_v47, %s3804_s15 }
 0x78e   :  { %1081 = vrot.lane.b32.xlu1 %v4285_v55, %s3804_s15 }
 0x78f   :  { %3572 = vrot.lane.b32.xlu0 %v3571_v41, %s3804_s15 }
 0x7fa   :  { %v892_v54 = vpop.xlane.xlu0 %891 }
 0x7fb   :  { %v900_v56 = vmul.f32 0.03125, %v892_v54  ;;  %v889_v57 = vpop.xlane.xlu1 %888 }
 0x7fc   :  { %v899_v59 = vmul.f32 0.03125, %v889_v57 }
 0x7fd   :  { %v904_v62 = vadd.f32 1e-12, %v900_v56 }
 0x7fe   :  { %v903_v0 = vadd.f32 1e-12, %v899_v59 }
 0x7ff   :  { %3705 = vrsqrt.f32 %v904_v62 }
 0x800   :  { %3707 = vrsqrt.f32 %v903_v0 }
 0x802   :  { %v895_v4 = vpop.xlane.xlu1 %894 }
 0x803   :  { %v901_v13 = vmul.f32 0.03125, %v895_v4 }
 0x805   :  { %v905_v16 = vadd.f32 1e-12, %v901_v13 }
 0x806   :  { %v898_v15 = vpop.xlane.xlu0 %897  ;;  %v925_v25 = vpop.permute.xlu1 %924 }
 0x807   :  { %3709 = vrsqrt.f32 %v905_v16  ;;  %v902_v3 = vmul.f32 0.03125, %v898_v15 }
 0x809   :  { %v3706_v61 = vpop.eup %3705  ;;  %v906_v17 = vadd.f32 1e-12, %v902_v3 }
 0x80a   :  { %v3708_v22 = vpop.eup %3707  ;;  %v912_v24 = vmul.f32 %v3706_v61, %v880_v39  ;;  %v3578_v49 = vpop.permute.xlu1 %3577 }
 0x80b   :  { %3711 = vrsqrt.f32 %v906_v17  ;;  %v911_v21 = vmul.f32 %v3708_v22, %v879_v20  ;;  %v3580_v10 = vunpack.i.h.bf16 %v3578_v49  ;;  %v3579_v40 = vunpack.i.l.bf16 %v3578_v49 }
 0x80c   :  { %v920_v27 = vmul.f32 %v4263_v46, %v912_v24 }
 0x80d   :  { %v919_v5 = vmul.f32 %v4263_v46, %v911_v21  ;;  %v3314_v41 = vpack.c.bf16 %v3580_v10, %v3579_v40 }
 0x80e   :  { %v4293_v34 = vadd.f32 %v925_v25, %v920_v27 }
 0x80f   :  { %v4291_v32 = vadd.f32 %v925_v25, %v919_v5 }
 0x811   :  { %v3710_v28 = vpop.eup %3709  ;;  %2966 = vmatprep.mubr.msk.f32.mxu0 %vm62_vm0, %v4291_v32 }
 0x812   :  { %v913_v29 = vmul.f32 %v3710_v28, %v881_v7  ;;  %2967 = vmatmul.mubr.msk.f32.vlgmr.msra.gmra.mrb[12].mxu0 %vm62_vm0, %v4293_v34  ;;  %v3573_v7 = vpop.permute.xlu0 %3572 }
 0x813   :  { %v3575_v38 = vunpack.i.h.bf16 %v3573_v7  ;;  %v3574_v26 = vunpack.i.l.bf16 %v3573_v7 }
 0x814   :  { %v921_v39 = vmul.f32 %v4263_v46, %v913_v29 }
 0x815   :  { %v3712_v20 = vpop.eup %3711  ;;  %v3308_v35 = vpack.c.bf16 %v3575_v38, %v3574_v26 }
 0x816   :  { %v914_v31 = vmul.f32 %v3712_v20, %v882_v11  ;;  %v4300_v30 = vadd.f32 %v925_v25, %v921_v39 }
 0x817   :  { %3310 = vmatprep.subr.msk.bf16.mxu1 %vm4311_vm13, %v3308_v35 }
 0x818   :  { %v922_v33 = vmul.f32 %v4263_v46, %v914_v31  ;;  %2969 = vmatprep.mubr.msk.f32.mxu0 %vm62_vm0, %v4300_v30  ;;  %3313 = vmatpush3.bf16.xpose.msk.msra.mxu1 %vm4311_vm13, %v3308_v35 }
 0x819   :  { %3316 = vmatprep.subr.msk.bf16.mxu1 %vm4311_vm13, %v3314_v41 }
 0x81a   :  { %v4305_v42 = vadd.f32 %v925_v25, %v922_v33 }
 0x81c   :  { %2970 = vmatmul.mubr.msk.f32.gmra.mrb[14].mxu0 %vm62_vm0, %v4305_v42 }
 0x820   :  { %3319 = vmatpush3.bf16.xpose.msk.msra.mxu1 %vm4311_vm13, %v3314_v41 }
 0x821   :  { %3377 = vmatprep.subr.bf16.mxu1 %v4079_v58 }
 0x8e5   :  { %v2968_v47 = vpop.f32.mrb[12].mxu0 }
 0x8e6   :  { %v1019_v53 = vadd.f32 %v2968_v47, %v4285_v55  ;;  %v1013_v54 = vpop.f32.mrb[13].mxu0 }
 0x8e7   :  { %v1014_v56 = vadd.f32 %v1013_v54, %v4285_v55 }
 0x8e8   :  { %v1037_v57 = vmul.f32 0.044715, %v1019_v53  ;;  %v1033_v10 = vmul.f32 0.5, %v1019_v53 }
 0x8e9   :  { %v1036_v59 = vmul.f32 0.044715, %v1014_v56  ;;  %v1032_v49 = vmul.f32 0.5, %v1014_v56 }
 0x8ea   :  { %v1041_v62 = vmul.f32 %v1037_v57, %v1019_v53 }
 0x8eb   :  { %v1040_v0 = vmul.f32 %v1036_v59, %v1014_v56 }
 0x8ec   :  { %v1045_v4 = vmul.f32 %v1041_v62, %v1019_v53 }
 0x8ed   :  { %v1044_v13 = vmul.f32 %v1040_v0, %v1014_v56 }
 0x8ee   :  { %v1049_v16 = vadd.f32 %v1045_v4, %v1019_v53 }
 0x8ef   :  { %v1048_v15 = vadd.f32 %v1044_v13, %v1014_v56  ;;  %v2971_v3 = vpop.f32.mrb[14].mxu0 }
 0x8f0   :  { %v1053_v61 = vmul.f32 0.7978846, %v1049_v16  ;;  %v1029_v17 = vadd.f32 %v2971_v3, %v4285_v55  ;;  %v1023_v22 = vpop.f32.mrb[15].mxu0 }
 0x8f1   :  { %v1024_v24 = vadd.f32 %v1023_v22, %v4285_v55  ;;  %v1052_v21 = vmul.f32 0.7978846, %v1048_v15 }
 0x8f2   :  { %3713 = vtanh.f32 %v1053_v61  ;;  %v1039_v25 = vmul.f32 0.044715, %v1029_v17  ;;  %v1035_v56 = vmul.f32 0.5, %v1029_v17 }
 0x8f3   :  { %v1038_v27 = vmul.f32 0.044715, %v1024_v24  ;;  %3715 = vtanh.f32 %v1052_v21  ;;  %v1034_v59 = vmul.f32 0.5, %v1024_v24 }
 0x8f4   :  { %v1043_v5 = vmul.f32 %v1039_v25, %v1029_v17 }
 0x8f5   :  { %v1042_v28 = vmul.f32 %v1038_v27, %v1024_v24 }
 0x8f6   :  { %v1047_v29 = vmul.f32 %v1043_v5, %v1029_v17 }
 0x8f7   :  { %v1046_v39 = vmul.f32 %v1042_v28, %v1024_v24 }
 0x8f8   :  { %v1051_v20 = vadd.f32 %v1047_v29, %v1029_v17 }
 0x8f9   :  { %v1050_v31 = vadd.f32 %v1046_v39, %v1024_v24 }
 0x8fa   :  { %v1055_v33 = vmul.f32 0.7978846, %v1051_v20 }
 0x8fb   :  { %v1054_v7 = vmul.f32 0.7978846, %v1050_v31 }
 0x8fc   :  { %v3714_v38 = vpop.eup %3713  ;;  %3717 = vtanh.f32 %v1055_v33 }
 0x8fd   :  { %v3716_v26 = vpop.eup %3715  ;;  %v1061_v35 = vadd.f32 1.0, %v3714_v38  ;;  %3719 = vtanh.f32 %v1054_v7 }
 0x8fe   :  { %v1060_v55 = vadd.f32 1.0, %v3716_v26 }
 0x8ff   :  { %v1065_v41 = vmul.f32 %v1061_v35, %v1033_v10  ;;  %v4364_v10 = vld [vmem:[%s4702_s2 + $0x50] sm:$0xff] }
 0x900   :  { %v1064_v40 = vmul.f32 %v1060_v55, %v1032_v49 }
 0x902   :  { %2980 = vmatprep.mubr.msk.f32.mxu1 %vm1084_vm12, %v1064_v40  ;;  %v4369_v40 = vld [vmem:[%s4702_s2 + $0x60] sm:$0xff] }
 0x903   :  { %2981 = vmatmul.mubr.msk.f32.vlgmr.msra.gmra.mrb[8].mxu1 %vm1084_vm12, %v1065_v41  ;;  %v3320_v41 = vpack.c.bf16 %v4369_v40, %v4364_v10 }
 0x904   :  { %3379 = vmatpush3.bf16.msra.mxu1 %v4079_v58  ;;  %v1082_v58 = vpop.permute.xlu1 %1081 }
 0x905   :  { %3381 = vmatprep.subr.bf16.mxu1 %v4084_v60  ;;  %3321 = vmatprep.subr.bf16.mxu0 %v3320_v41 }
 0x906   :  { %v3718_v47 = vpop.eup %3717  ;;  %3323 = vmatpush3.bf16.msra.mxu0 %v3320_v41 }
 0x907   :  { %v3720_v54 = vpop.eup %3719  ;;  %v1063_v57 = vadd.f32 1.0, %v3718_v47  ;;  %v4376_v47 = vld [vmem:[%s4702_s2 + $0x70] sm:$0xff] }
 0x908   :  { %v1062_v62 = vadd.f32 1.0, %v3720_v54  ;;  %3383 = vmatpush3.bf16.msra.mxu1 %v4084_v60  ;;  %v4381_v54 = vld [vmem:[%s4702_s2 + $0x80] sm:$0xff] }
 0x909   :  { %3385 = vmatprep.subr.bf16.mxu1 %v4095_v1  ;;  %v1067_v0 = vmul.f32 %v1063_v57, %v1035_v56  ;;  %v3324_v57 = vpack.c.bf16 %v4381_v54, %v4376_v47 }
 0x90a   :  { %v1066_v53 = vmul.f32 %v1062_v62, %v1034_v59 }
 0x90b   :  { %3325 = vmatprep.subr.bf16.mxu0 %v3324_v57 }
 0x90c   :  { %2983 = vmatprep.mubr.msk.f32.mxu1 %vm1084_vm12, %v1066_v53  ;;  %3387 = vmatpush3.bf16.msra.mxu1 %v4095_v1 }
 0x90d   :  { %2984 = vmatmul.mubr.msk.f32.gmra.mrb[10].mxu1 %vm1084_vm12, %v1067_v0  ;;  %3389 = vmatprep.subr.bf16.mxu1 %v4105_v6 }
 0x90e   :  { %3327 = vmatpush3.bf16.msra.mxu0 %v3324_v57 }
 0x910   :  { %3391 = vmatpush3.bf16.msra.mxu1 %v4105_v6 }
 0x911   :  { %3393 = vmatprep.subr.bf16.mxu1 %v4128_v45 }
 0x914   :  { %3395 = vmatpush3.bf16.msra.mxu1 %v4128_v45 }
 0x915   :  { %3397 = vmatprep.subr.bf16.mxu1 %v4140_v48 }
 0x918   :  { %3399 = vmatpush3.bf16.msra.mxu1 %v4140_v48 }
 0x919   :  { %3401 = vmatprep.subr.bf16.mxu1 %v4152_v50 }
 0x91c   :  { %3403 = vmatpush3.bf16.msra.mxu1 %v4152_v50 }
 0x91d   :  { %3405 = vmatprep.subr.bf16.mxu1 %v4164_v52 }
 0x920   :  { %3407 = vmatpush3.bf16.msra.mxu1 %v4164_v52 }
 0x9d6   :  { %v2982_v60 = vpop.f32.mrb[8].mxu1 }
 0x9d7   :  { %v1177_v1 = vadd.f32 %v2982_v60, %v1082_v58  ;;  %v1171_v6 = vpop.f32.mrb[9].mxu1 }
 0x9d8   :  { %v1172_v4 = vadd.f32 %v1171_v6, %v1082_v58 }
 0x9d9   :  { %v1191_v13 = vadd.f32 %v1177_v1, %v4293_v34 }
 0x9da   :  { %v1190_v45 = vadd.f32 %v1172_v4, %v4291_v32 }
 0x9db   :  { %v1197_v16 = vsel %vm62_vm0, %v1191_v13, 0.0 }
 0x9dc   :  { %1198 = vadd.xlane.f32.xlu0 %v1197_v16  ;;  %v1194_v48 = vsel %vm62_vm0, %v1190_v45, 0.0 }
 0x9dd   :  { %1195 = vadd.xlane.f32.xlu1 %v1194_v48 }
 0x9e0   :  { %v2985_v50 = vpop.f32.mrb[10].mxu1 }
 0x9e1   :  { %v1181_v15 = vpop.f32.mrb[11].mxu1  ;;  %v1187_v3 = vadd.f32 %v2985_v50, %v1082_v58 }
 0x9e2   :  { %v1182_v61 = vadd.f32 %v1181_v15, %v1082_v58 }
 0x9e3   :  { %v1193_v22 = vadd.f32 %v1187_v3, %v4305_v42 }
 0x9e4   :  { %v1192_v52 = vadd.f32 %v1182_v61, %v4300_v30 }
 0x9e5   :  { %v1203_v34 = vsel %vm62_vm0, %v1193_v22, 0.0 }
 0x9e6   :  { %v1200_v17 = vsel %vm62_vm0, %v1192_v52, 0.0 }
 0x9e7   :  { %1201 = vadd.xlane.f32.xlu0 %v1200_v17 }
 0x9eb   :  { %1204 = vadd.xlane.f32.xlu0 %v1203_v34 }
 0xa69   :  { %v1199_v32 = vpop.xlane.xlu0 %1198 }
 0xa6a   :  { %v1207_v24 = vmul.f32 0.03125, %v1199_v32  ;;  %v1196_v21 = vpop.xlane.xlu1 %1195 }
 0xa6b   :  { %v1206_v25 = vmul.f32 0.03125, %v1196_v21 }
 0xa6c   :  { %v1211_v27 = vsub.f32 %v1191_v13, %v1207_v24 }
 0xa6d   :  { %v1210_v5 = vsub.f32 %v1190_v45, %v1206_v25 }
 0xa6e   :  { %v1215_v28 = vmul.f32 %v1211_v27, %v1211_v27 }
 0xa6f   :  { %v1214_v29 = vmul.f32 %v1210_v5, %v1210_v5 }
 0xa70   :  { %v1221_v39 = vsel %vm62_vm0, %v1215_v28, 0.0 }
 0xa71   :  { %1222 = vadd.xlane.f32.xlu0 %v1221_v39  ;;  %v1218_v30 = vsel %vm62_vm0, %v1214_v29, 0.0  ;;  %v4406_v29 = vld [vmem:[%s4702_s2 + $0x90] sm:$0x3] }
 0xa72   :  { %1219 = vadd.xlane.f32.xlu1 %v1218_v30  ;;  %v4410_v39 = vrot.slane %v4406_v29, %v3953_v9 }
 0xa74   :  { %v1202_v20 = vpop.xlane.xlu0 %1201 }
 0xa75   :  { %v1208_v42 = vmul.f32 0.03125, %v1202_v20 }
 0xa77   :  { %v1212_v31 = vsub.f32 %v1192_v52, %v1208_v42 }
 0xa78   :  { %v1205_v33 = vpop.xlane.xlu0 %1204 }
 0xa79   :  { %v1209_v7 = vmul.f32 0.03125, %v1205_v33  ;;  %v1216_v38 = vmul.f32 %v1212_v31, %v1212_v31 }
 0xa7b   :  { %v1213_v26 = vsub.f32 %v1193_v22, %v1209_v7  ;;  %v1224_v35 = vsel %vm62_vm0, %v1216_v38, 0.0 }
 0xa7c   :  { %1225 = vadd.xlane.f32.xlu1 %v1224_v35 }
 0xa7d   :  { %v1217_v49 = vmul.f32 %v1213_v26, %v1213_v26 }
 0xa7f   :  { %v1227_v55 = vsel %vm62_vm0, %v1217_v49, 0.0 }
 0xa80   :  { %1228 = vadd.xlane.f32.xlu0 %v1227_v55 }
 0xa8d   :  { %1246 = vrot.lane.b32.xlu1 %v4263_v46, %s3804_s15 }
 0xa96   :  { %1253 = vrot.lane.b32.xlu0 %v4263_v46, %s3802_s30 }
 0xafe   :  { %v1223_v59 = vpop.xlane.xlu0 %1222 }
 0xaff   :  { %v1231_v62 = vmul.f32 0.03125, %v1223_v59  ;;  %v1220_v56 = vpop.xlane.xlu1 %1219 }
 0xb00   :  { %v1230_v53 = vmul.f32 0.03125, %v1220_v56 }
 0xb01   :  { %v1235_v0 = vadd.f32 1e-12, %v1231_v62 }
 0xb02   :  { %v1234_v58 = vadd.f32 1e-12, %v1230_v53 }
 0xb03   :  { %3721 = vrsqrt.f32 %v1235_v0 }
 0xb04   :  { %3723 = vrsqrt.f32 %v1234_v58 }
 0xb09   :  { %v1226_v60 = vpop.xlane.xlu1 %1225 }
 0xb0a   :  { %v1232_v1 = vmul.f32 0.03125, %v1226_v60 }
 0xb0c   :  { %v1236_v6 = vadd.f32 1e-12, %v1232_v1 }
 0xb0d   :  { %v3722_v4 = vpop.eup %3721  ;;  %v1229_v13 = vpop.xlane.xlu0 %1228 }
 0xb0e   :  { %v1247_v45 = vpop.permute.xlu1 %1246  ;;  %v3724_v16 = vpop.eup %3723  ;;  %3725 = vrsqrt.f32 %v1236_v6  ;;  %v1233_v48 = vmul.f32 0.03125, %v1229_v13  ;;  %v1243_v50 = vmul.f32 %v3722_v4, %v1211_v27 }
 0xb0f   :  { %v1242_v15 = vmul.f32 %v3724_v16, %v1210_v5 }
 0xb10   :  { %v1237_v46 = vadd.f32 1e-12, %v1233_v48  ;;  %v1250_v3 = vmul.f32 %v1247_v45, %v1243_v50 }
 0xb11   :  { %v1249_v61 = vmul.f32 %v1247_v45, %v1242_v15  ;;  %v1254_v52 = vpop.permute.xlu0 %1253 }
 0xb12   :  { %3727 = vrsqrt.f32 %v1237_v46  ;;  %v4389_v22 = vadd.f32 %v1254_v52, %v1250_v3 }
 0xb13   :  { %v4387_v17 = vadd.f32 %v1254_v52, %v1249_v61 }
 0xb15   :  { %2994 = vmatprep.mubr.msk.f32.mxu0 %vm62_vm0, %v4387_v17 }
 0xb16   :  { %2995 = vmatmul.mubr.msk.f32.vlgmr.msra.gmra.mrb[16].mxu0 %vm62_vm0, %v4389_v22 }
 0xb18   :  { %v3726_v34 = vpop.eup %3725 }
 0xb19   :  { %v1244_v32 = vmul.f32 %v3726_v34, %v1212_v31 }
 0xb1b   :  { %v1251_v24 = vmul.f32 %v1247_v45, %v1244_v32 }
 0xb1c   :  { %v3728_v21 = vpop.eup %3727 }
 0xb1d   :  { %v1245_v25 = vmul.f32 %v3728_v21, %v1213_v26  ;;  %v4395_v27 = vadd.f32 %v1254_v52, %v1251_v24 }
 0xb1f   :  { %v1252_v5 = vmul.f32 %v1247_v45, %v1245_v25  ;;  %2997 = vmatprep.mubr.msk.f32.mxu0 %vm62_vm0, %v4395_v27 }
 0xb21   :  { %v4399_v28 = vadd.f32 %v1254_v52, %v1252_v5 }
 0xb23   :  { %2998 = vmatmul.mubr.msk.f32.gmra.mrb[18].mxu0 %vm62_vm0, %v4399_v28 }
 0xbe9   :  { %v2996_v30 = vpop.f32.mrb[16].mxu0 }
 0xbea   :  { %v4413_v20 = vadd.f32 %v2996_v30, %v4410_v39  ;;  %v1353_v42 = vpop.f32.mrb[17].mxu0 }
 0xbeb   :  { %v4416_v31 = vadd.f32 %v1353_v42, %v4410_v39 }
 0xbec   :  { %v1373_v33 = vmul.f32 %v4413_v20, %v3966_v14  ;;  %v1377_v53 = vmul.f32 %v4413_v20, %v3964_v12  ;;  %v1381_v6 = vmul.f32 %v4413_v20, %v3976_v19 }
 0xbed   :  { %3032 = vmatprep.mubr.msk.f32.mxu0 %vm62_vm0, %v4416_v31  ;;  %v1372_v7 = vmul.f32 %v4416_v31, %v3966_v14  ;;  %v1376_v56 = vmul.f32 %v4416_v31, %v3964_v12  ;;  %v1384_v50 = vmul.f32 %v4416_v31, %v4001_v43 }
 0xbef   :  { %v3581_v38 = vpack.i.bf16 %v1373_v33, %v1372_v7 }
 0xbf1   :  { %3582 = vrot.lane.b32.xlu1 %v3581_v38, %s3803_s11 }
 0xbf6   :  { %v2999_v26 = vpop.f32.mrb[18].mxu0 }
 0xbf7   :  { %v4426_v35 = vadd.f32 %v2999_v26, %v4410_v39  ;;  %v1363_v49 = vpop.f32.mrb[19].mxu0 }
 0xbf8   :  { %v4429_v55 = vadd.f32 %v1363_v49, %v4410_v39 }
 0xbf9   :  { %v1379_v41 = vmul.f32 %v4426_v35, %v3964_v12  ;;  %v1375_v57 = vmul.f32 %v4426_v35, %v3966_v14  ;;  %v1383_v1 = vmul.f32 %v4426_v35, %v3976_v19  ;;  %v1387_v45 = vmul.f32 %v4426_v35, %v4001_v43 }
 0xbfa   :  { %v1378_v59 = vmul.f32 %v4429_v55, %v3964_v12  ;;  %v1374_v62 = vmul.f32 %v4429_v55, %v3966_v14  ;;  %v1382_v60 = vmul.f32 %v4429_v55, %v3976_v19  ;;  %v1380_v14 = vmul.f32 %v4416_v31, %v3976_v19 }
 0xbfb   :  { %v3591_v12 = vpack.i.bf16 %v1377_v53, %v1376_v56  ;;  %v1386_v13 = vmul.f32 %v4429_v55, %v4001_v43  ;;  %v1385_v19 = vmul.f32 %v4413_v20, %v4001_v43 }
 0xbfc   :  { %v3596_v0 = vpack.i.bf16 %v1379_v41, %v1378_v59  ;;  %v3586_v58 = vpack.i.bf16 %v1375_v57, %v1374_v62  ;;  %v3606_v4 = vpack.i.bf16 %v1383_v1, %v1382_v60  ;;  %v3601_v48 = vpack.i.bf16 %v1381_v6, %v1380_v14 }
 0xbfd   :  { %v3616_v16 = vpack.i.bf16 %v1387_v45, %v1386_v13  ;;  %v3611_v15 = vpack.i.bf16 %v1385_v19, %v1384_v50  ;;  %v3773_v45 = vld [vmem:[%s4701_s1 + $0x8] sm:$0xff] }
 0xbfe   :  { %3597 = vrot.lane.b32.xlu0 %v3596_v0, %s3803_s11  ;;  %3587 = vrot.lane.b32.xlu1 %v3586_v58, %s3803_s11 }
 0xc02   :  { %3607 = vrot.lane.b32.xlu0 %v3606_v4, %s3803_s11  ;;  %3592 = vrot.lane.b32.xlu1 %v3591_v12, %s3803_s11 }
 0xc06   :  { %3617 = vrot.lane.b32.xlu0 %v3616_v16, %s3803_s11  ;;  %3602 = vrot.lane.b32.xlu1 %v3601_v48, %s3803_s11 }
 0xc0a   :  { %3612 = vrot.lane.b32.xlu1 %v3611_v15, %s3803_s11 }
 0xc63   :  { %v3583_v46 = vpop.permute.xlu1 %3582 }
 0xc64   :  { %v3585_v3 = vunpack.i.h.bf16 %v3583_v46  ;;  %v3584_v61 = vunpack.i.l.bf16 %v3583_v46  ;;  %v1390_v46 = vmul.f32 %v4429_v55, %v4172_v18 }
 0xc66   :  { %v3328_v52 = vpack.c.bf16 %v3585_v3, %v3584_v61  ;;  %v1391_v3 = vmul.f32 %v4426_v35, %v4172_v18  ;;  %v1388_v61 = vmul.f32 %v4416_v31, %v4172_v18 }
 0xc68   :  { %3330 = vmatprep.subr.msk.bf16.mxu0 %vm4028_vm11, %v3328_v52 }
 0xc69   :  { %3333 = vmatpush3.bf16.xpose.msk.msra.mxu0 %vm4028_vm11, %v3328_v52  ;;  %v1389_v52 = vmul.f32 %v4413_v20, %v4172_v18  ;;  %v1396_v18 = vmul.f32 %v4416_v31, %v4180_v23 }
 0xc70   :  { %v3588_v34 = vpop.permute.xlu1 %3587  ;;  %v3598_v30 = vpop.permute.xlu0 %3597 }
 0xc71   :  { %v3590_v32 = vunpack.i.h.bf16 %v3588_v34  ;;  %v3589_v43 = vunpack.i.l.bf16 %v3588_v34  ;;  %v3600_v33 = vunpack.i.h.bf16 %v3598_v30  ;;  %v3599_v7 = vunpack.i.l.bf16 %v3598_v30 }
 0xc72   :  { %v1392_v34 = vmul.f32 %v4416_v31, %v4170_v2  ;;  %v1397_v30 = vmul.f32 %v4413_v20, %v4180_v23 }
 0xc73   :  { %v3334_v24 = vpack.c.bf16 %v3590_v32, %v3589_v43  ;;  %v3346_v38 = vpack.c.bf16 %v3600_v33, %v3599_v7  ;;  %v1393_v32 = vmul.f32 %v4413_v20, %v4170_v2  ;;  %v3626_v43 = vpack.i.bf16 %v1391_v3, %v1390_v46 }
 0xc74   :  { %v3593_v21 = vpop.permute.xlu1 %3592  ;;  %v3608_v59 = vpop.permute.xlu0 %3607  ;;  %v3641_v33 = vpack.i.bf16 %v1397_v30, %v1396_v18  ;;  %v1398_v7 = vmul.f32 %v4429_v55, %v4180_v23 }
 0xc75   :  { %v3595_v25 = vunpack.i.h.bf16 %v3593_v21  ;;  %v3594_v5 = vunpack.i.l.bf16 %v3593_v21  ;;  %3336 = vmatprep.subr.msk.bf16.mxu0 %vm4028_vm11, %v3334_v24  ;;  %v3610_v62 = vunpack.i.h.bf16 %v3608_v59  ;;  %v3609_v56 = vunpack.i.l.bf16 %v3608_v59 }
 0xc76   :  { %3339 = vmatpush3.bf16.xpose.msk.msra.mxu0 %vm4028_vm11, %v3334_v24  ;;  %v3621_v24 = vpack.i.bf16 %v1389_v52, %v1388_v61  ;;  %v3631_v21 = vpack.i.bf16 %v1393_v32, %v1392_v34  ;;  %v1401_v59 = vmul.f32 %v4413_v20, %v4206_v51 }
 0xc77   :  { %v3340_v42 = vpack.c.bf16 %v3595_v25, %v3594_v5  ;;  %v3358_v53 = vpack.c.bf16 %v3610_v62, %v3609_v56  ;;  %v1394_v25 = vmul.f32 %v4429_v55, %v4170_v2  ;;  %v1395_v5 = vmul.f32 %v4426_v35, %v4170_v2 }
 0xc78   :  { %v3603_v26 = vpop.permute.xlu1 %3602  ;;  %v3618_v14 = vpop.permute.xlu0 %3617  ;;  %v1402_v56 = vmul.f32 %v4429_v55, %v4206_v51 }
 0xc79   :  { %3342 = vmatprep.subr.msk.bf16.mxu0 %vm4028_vm11, %v3340_v42  ;;  %v3605_v49 = vunpack.i.h.bf16 %v3603_v26  ;;  %v3604_v41 = vunpack.i.l.bf16 %v3603_v26  ;;  %v3620_v6 = vunpack.i.h.bf16 %v3618_v14  ;;  %v3619_v4 = vunpack.i.l.bf16 %v3618_v14  ;;  %v3775_v26 = vld [vmem:[%s4701_s1 + $0x10] sm:$0xff] }
 0xc7b   :  { %v3352_v57 = vpack.c.bf16 %v3605_v49, %v3604_v41  ;;  %v3370_v12 = vpack.c.bf16 %v3620_v6, %v3619_v4  ;;  %v3776_v41 = vld [vmem:[%s4701_s1 + $0x18] sm:$0xff] }
 0xc7c   :  { %v3613_v0 = vpop.permute.xlu1 %3612 }
 0xc7d   :  { %v3615_v58 = vunpack.i.h.bf16 %v3613_v0  ;;  %v3614_v60 = vunpack.i.l.bf16 %v3613_v0 }
 0xc7e   :  { %3345 = vmatpush3.bf16.xpose.msk.msra.mxu0 %vm4028_vm11, %v3340_v42  ;;  %v3636_v42 = vpack.i.bf16 %v1395_v5, %v1394_v25 }
 0xc7f   :  { %3348 = vmatprep.subr.msk.bf16.mxu0 %vm4028_vm11, %v3346_v38  ;;  %v3364_v1 = vpack.c.bf16 %v3615_v58, %v3614_v60 }
 0xc86   :  { %3351 = vmatpush3.bf16.xpose.msk.msra.mxu0 %vm4028_vm11, %v3346_v38  ;;  %v1399_v38 = vmul.f32 %v4426_v35, %v4180_v23  ;;  %v1400_v23 = vmul.f32 %v4416_v31, %v4206_v51 }
 0xc87   :  { %3354 = vmatprep.subr.msk.bf16.mxu0 %vm4028_vm11, %v3352_v57 }
 0xc88   :  { %v3646_v2 = vpack.i.bf16 %v1399_v38, %v1398_v7  ;;  %v3651_v62 = vpack.i.bf16 %v1401_v59, %v1400_v23 }
 0xc8e   :  { %3357 = vmatpush3.bf16.xpose.msk.msra.mxu0 %vm4028_vm11, %v3352_v57 }
 0xc8f   :  { %3360 = vmatprep.subr.msk.bf16.mxu0 %vm4028_vm11, %v3358_v53 }
 0xc96   :  { %3363 = vmatpush3.bf16.xpose.msk.msra.mxu0 %vm4028_vm11, %v3358_v53  ;;  %v1403_v53 = vmul.f32 %v4426_v35, %v4206_v51 }
 0xc97   :  { %3366 = vmatprep.subr.msk.bf16.mxu0 %vm4028_vm11, %v3364_v1 }
 0xc98   :  { %v3656_v0 = vpack.i.bf16 %v1403_v53, %v1402_v56 }
 0xc9e   :  { %3369 = vmatpush3.bf16.xpose.msk.msra.mxu0 %vm4028_vm11, %v3364_v1 }
 0xc9f   :  { %3372 = vmatprep.subr.msk.bf16.mxu0 %vm4028_vm11, %v3370_v12 }
 0xca6   :  { %3375 = vmatpush3.bf16.xpose.msk.msra.mxu0 %vm4028_vm11, %v3370_v12 }
 0xcad   :  { %3033 = vmatmul.mubr.msk.f32.vlgmr.msra.gmra.mrb[20].mxu0 %vm62_vm0, %v4413_v20 }
 0xcae   :  { %3035 = vmatprep.mubr.msk.f32.mxu0 %vm62_vm0, %v4429_v55 }
 0xcb1   :  { %3036 = vmatmul.mubr.msk.f32.gmra.mrb[22].mxu0 %vm62_vm0, %v4426_v35 }
 0xd80   :  { %v3034_v13 = vpop.f32.mrb[20].mxu0 }
 0xd81   :  { %v1568_v16 = vadd.f32 %v3773_v45, %v3034_v13  ;;  %v1562_v48 = vpop.f32.mrb[21].mxu0 }
 0xd82   :  { %v1563_v50 = vadd.f32 %v3774_v63, %v1562_v48 }
 0xd83   :  { %1583 = vmax.xlane.f32.xlu0 %v1568_v16 }
 0xd84   :  { %v3037_v19 = vpop.f32.mrb[22].mxu0  ;;  %1581 = vmax.xlane.f32.xlu1 %v1563_v50 }
 0xd85   :  { %v1572_v15 = vpop.f32.mrb[23].mxu0  ;;  %v4548_v57 = vadd.f32 %v3776_v41, %v3037_v19 }
 0xd86   :  { %v4543_v49 = vadd.f32 %v3775_v26, %v1572_v15 }
 0xd95   :  { %3627 = vrot.lane.b32.xlu1 %v3626_v43, %s3804_s15 }
 0xd99   :  { %3622 = vrot.lane.b32.xlu0 %v3621_v24, %s3804_s15  ;;  %3632 = vrot.lane.b32.xlu1 %v3631_v21, %s3804_s15 }
 0xd9d   :  { %3637 = vrot.lane.b32.xlu0 %v3636_v42, %s3804_s15  ;;  %3642 = vrot.lane.b32.xlu1 %v3641_v33, %s3804_s15 }
 0xda1   :  { %3647 = vrot.lane.b32.xlu0 %v3646_v2, %s3804_s15 }
 0xdc0   :  { %1585 = vmax.xlane.f32.xlu0 %v4543_v49 }
 0xdc1   :  { %1587 = vmax.xlane.f32.xlu1 %v4548_v57 }
 0xdd2   :  { %3652 = vrot.lane.b32.xlu1 %v3651_v62, %s3804_s15 }
 0xdd6   :  { %3657 = vrot.lane.b32.xlu0 %v3656_v0, %s3804_s15 }
 0xe10   :  { %v1584_v58 = vpop.xlane.xlu0 %1583 }
 0xe11   :  { %v1590_v60 = vsub.f32 %v1568_v16, %v1584_v58  ;;  %v1582_v1 = vpop.xlane.xlu1 %1581 }
 0xe12   :  { %v1589_v14 = vsub.f32 %v1563_v50, %v1582_v1 }
 0xe13   :  { %v1595_v31 = vmul.f32 1.442695, %v1590_v60  ;;  %v3666_v60 = vpack.i.bf16 %v4381_v54, %v4376_v47 }
 0xe14   :  { %v1593_v6 = vmul.f32 1.442695, %v1589_v14  ;;  %v3623_v4 = vpop.permute.xlu0 %3622 }
 0xe15   :  { %v3625_v20 = vunpack.i.h.bf16 %v3623_v4  ;;  %v3624_v12 = vunpack.i.l.bf16 %v3623_v4  ;;  %v3628_v13 = vpop.permute.xlu1 %3627  ;;  %3667 = vrot.lane.b32.xlu0 %v3666_v60, %s3802_s30 }
 0xe16   :  { %3729 = vpow2.f32 %v1593_v6  ;;  %v3630_v51 = vunpack.i.h.bf16 %v3628_v13  ;;  %v3629_v35 = vunpack.i.l.bf16 %v3628_v13 }
 0xe17   :  { %3731 = vpow2.f32 %v1595_v31  ;;  %v3408_v55 = vpack.c.bf16 %v3625_v20, %v3624_v12 }
 0xe18   :  { %v3412_v16 = vpack.c.bf16 %v3630_v51, %v3629_v35  ;;  %v3638_v15 = vpop.permute.xlu0 %3637 }
 0xe19   :  { %3409 = vmatprep.subr.bf16.mxu1 %v3408_v55  ;;  %v3633_v45 = vpop.permute.xlu1 %3632  ;;  %v3640_v46 = vunpack.i.h.bf16 %v3638_v15  ;;  %v3639_v3 = vunpack.i.l.bf16 %v3638_v15 }
 0xe1a   :  { %v3635_v50 = vunpack.i.h.bf16 %v3633_v45  ;;  %v3634_v19 = vunpack.i.l.bf16 %v3633_v45 }
 0xe1b   :  { %v3420_v34 = vpack.c.bf16 %v3640_v46, %v3639_v3 }
 0xe1c   :  { %v3416_v61 = vpack.c.bf16 %v3635_v50, %v3634_v19  ;;  %v3648_v24 = vpop.permute.xlu0 %3647 }
 0xe1d   :  { %v3643_v52 = vpop.permute.xlu1 %3642  ;;  %v3650_v21 = vunpack.i.h.bf16 %v3648_v24  ;;  %v3649_v25 = vunpack.i.l.bf16 %v3648_v24 }
 0xe1e   :  { %v3645_v32 = vunpack.i.h.bf16 %v3643_v52  ;;  %v3644_v43 = vunpack.i.l.bf16 %v3643_v52 }
 0xe1f   :  { %v3428_v18 = vpack.c.bf16 %v3650_v21, %v3649_v25 }
 0xe20   :  { %v4562_v48 = vpop.eup %3729  ;;  %v3424_v5 = vpack.c.bf16 %v3645_v32, %v3644_v43 }
 0xe21   :  { %v4564_v63 = vpop.eup %3731  ;;  %3070 = vmatprep.mubr.f32.mxu1 %v4562_v48 }
 0xe22   :  { %3071 = vmatmul.mubr.f32.vlgmr.msra.gmra.mrb[12].mxu1 %v4564_v63 }
 0xe23   :  { %3411 = vmatpush3.bf16.msra.mxu1 %v3408_v55 }
 0xe24   :  { %3413 = vmatprep.subr.bf16.mxu1 %v3412_v16 }
 0xe27   :  { %3415 = vmatpush3.bf16.msra.mxu1 %v3412_v16 }
 0xe28   :  { %3417 = vmatprep.subr.bf16.mxu1 %v3416_v61 }
 0xe2b   :  { %3419 = vmatpush3.bf16.msra.mxu1 %v3416_v61 }
 0xe2c   :  { %3421 = vmatprep.subr.bf16.mxu1 %v3420_v34 }
 0xe2f   :  { %3423 = vmatpush3.bf16.msra.mxu1 %v3420_v34 }
 0xe30   :  { %3425 = vmatprep.subr.bf16.mxu1 %v3424_v5 }
 0xe33   :  { %3427 = vmatpush3.bf16.msra.mxu1 %v3424_v5  ;;  %v2572_v5 = vld [vmem:[%s4702_s2 + $0x58] sm:$0xff] }
 0xe34   :  { %3429 = vmatprep.subr.bf16.mxu1 %v3428_v18 }
 0xe37   :  { %3431 = vmatpush3.bf16.msra.mxu1 %v3428_v18  ;;  %v2574_v18 = vld [vmem:[%s4702_s2 + $0x68] sm:$0xff] }
 0xe4d   :  { %v1586_v30 = vpop.xlane.xlu0 %1585 }
 0xe4e   :  { %v1591_v42 = vsub.f32 %v4543_v49, %v1586_v30  ;;  %v1588_v33 = vpop.xlane.xlu1 %1587  ;;  %v3671_v30 = vpack.i.bf16 %v2574_v18, %v2572_v5 }
 0xe4f   :  { %v1592_v7 = vsub.f32 %v4548_v57, %v1588_v33  ;;  %v3661_v57 = vpack.i.bf16 %v4369_v40, %v4364_v10  ;;  %v2580_v33 = vld [vmem:[%s4702_s2 + $0x98] sm:$0x3] }
 0xe50   :  { %v1597_v38 = vmul.f32 1.442695, %v1591_v42 }
 0xe51   :  { %v1599_v2 = vmul.f32 1.442695, %v1592_v7  ;;  %v3658_v26 = vpop.permute.xlu0 %3657  ;;  %3662 = vrot.lane.b32.xlu1 %v3661_v57, %s3802_s30  ;;  %v4606_v7 = vrot.slane %v2580_v33, %v3953_v9 }
 0xe52   :  { %3733 = vpow2.f32 %v1597_v38  ;;  %v3660_v41 = vunpack.i.h.bf16 %v3658_v26  ;;  %v3653_v23 = vpop.permute.xlu1 %3652  ;;  %v3659_v59 = vunpack.i.l.bf16 %v3658_v26 }
 0xe53   :  { %3735 = vpow2.f32 %v1599_v2  ;;  %v3655_v62 = vunpack.i.h.bf16 %v3653_v23  ;;  %v3654_v56 = vunpack.i.l.bf16 %v3653_v23 }
 0xe54   :  { %v3436_v0 = vpack.c.bf16 %v3660_v41, %v3659_v59 }
 0xe55   :  { %v3432_v53 = vpack.c.bf16 %v3655_v62, %v3654_v56  ;;  %1860 = vrot.lane.b32.xlu1 %v4410_v39, %s3802_s30 }
 0xe57   :  { %3433 = vmatprep.subr.bf16.mxu1 %v3432_v53 }
 0xe58   :  { %3435 = vmatpush3.bf16.msra.mxu1 %v3432_v53 }
 0xe59   :  { %3437 = vmatprep.subr.bf16.mxu1 %v3436_v0 }
 0xe5c   :  { %v3734_v58 = vpop.eup %3733  ;;  %3439 = vmatpush3.bf16.msra.mxu1 %v3436_v0 }
 0xe5d   :  { %v3736_v49 = vpop.eup %3735  ;;  %3073 = vmatprep.mubr.f32.mxu1 %v3734_v58 }
 0xe5e   :  { %3074 = vmatmul.mubr.f32.gmra.mrb[14].mxu1 %v3736_v49 }
 0xe87   :  { %v3668_v20 = vpop.permute.xlu0 %3667 }
 0xe88   :  { %v3670_v55 = vunpack.i.h.bf16 %v3668_v20  ;;  %v3669_v13 = vunpack.i.l.bf16 %v3668_v20 }
 0xe8a   :  { %v3444_v35 = vpack.c.bf16 %v3670_v55, %v3669_v13 }
 0xec3   :  { %v3663_v54 = vpop.permute.xlu1 %3662 }
 0xec4   :  { %v3665_v12 = vunpack.i.h.bf16 %v3663_v54  ;;  %v3664_v39 = vunpack.i.l.bf16 %v3663_v54  ;;  %v3448_v54 = vpack.c.bf16 %v2574_v18, %v2572_v5 }
 0xec6   :  { %v3440_v51 = vpack.c.bf16 %v3665_v12, %v3664_v39  ;;  %3449 = vmatprep.subr.bf16.mxu1 %v3448_v54 }
 0xec7   :  { %v1861_v3 = vpop.permute.xlu1 %1860 }
 0xec8   :  { %3441 = vmatprep.subr.bf16.mxu0 %v3440_v51 }
 0xec9   :  { %3443 = vmatpush3.bf16.msra.mxu0 %v3440_v51 }
 0xeca   :  { %3445 = vmatprep.subr.bf16.mxu0 %v3444_v35 }
 0xecd   :  { %3447 = vmatpush3.bf16.msra.mxu0 %v3444_v35 }
 0xef5   :  { %v3072_v1 = vpop.f32.mrb[12].mxu1 }
 0xef6   :  { %3737 = vrcp.f32 %v3072_v1  ;;  %v1667_v14 = vpop.f32.mrb[13].mxu1 }
 0xef7   :  { %3739 = vrcp.f32 %v1667_v14 }
 0xf00   :  { %v3738_v31 = vpop.eup %3737 }
 0xf01   :  { %v3740_v6 = vpop.eup %3739  ;;  %v1691_v10 = vmul.f32 %v3738_v31, %v4564_v63 }
 0xf02   :  { %v1690_v4 = vmul.f32 %v3740_v6, %v4562_v48 }
 0xf04   :  { %3108 = vmatprep.mubr.f32.mxu1 %v1690_v4 }
 0xf05   :  { %3109 = vmatmul.mubr.f32.vlgmr.msra.gmra.mrb[16].mxu1 %v1691_v10 }
 0xf06   :  { %3451 = vmatpush3.bf16.msra.mxu1 %v3448_v54 }
 0xf31   :  { %v3075_v40 = vpop.f32.mrb[14].mxu1 }
 0xf32   :  { %3741 = vrcp.f32 %v3075_v40  ;;  %v1677_v47 = vpop.f32.mrb[15].mxu1 }
 0xf33   :  { %3743 = vrcp.f32 %v1677_v47  ;;  %v4628_v47 = vrot.slane %v4406_v29, %v917_v44 }
 0xf3c   :  { %v3742_v45 = vpop.eup %3741 }
 0xf3d   :  { %v3744_v48 = vpop.eup %3743  ;;  %v1693_v16 = vmul.f32 %v3742_v45, %v3736_v49 }
 0xf3e   :  { %v1692_v63 = vmul.f32 %v3744_v48, %v3734_v58 }
 0xf40   :  { %3111 = vmatprep.mubr.f32.mxu1 %v1692_v63 }
 0xf41   :  { %3112 = vmatmul.mubr.f32.gmra.mrb[18].mxu1 %v1693_v16 }
 0xfd8   :  { %v3110_v50 = vpop.f32.mrb[16].mxu1 }
 0xfd9   :  { %v1824_v19 = vpop.f32.mrb[17].mxu1 }
 0xfda   :  { %3122 = vmatprep.mubr.msk.f32.mxu0 %vm62_vm0, %v1824_v19 }
 0xfdb   :  { %3123 = vmatmul.mubr.msk.f32.vlgmr.msra.gmra.mrb[24].mxu0 %vm62_vm0, %v3110_v50 }
0x1014   :  { %v3113_v15 = vpop.f32.mrb[18].mxu1 }
0x1015   :  { %v1834_v46 = vpop.f32.mrb[19].mxu1 }
0x1016   :  { %3125 = vmatprep.mubr.msk.f32.mxu0 %vm62_vm0, %v1834_v46 }
0x1017   :  { %3126 = vmatmul.mubr.msk.f32.gmra.mrb[26].mxu0 %vm62_vm0, %v3113_v15 }
0x10ae   :  { %v3124_v61 = vpop.f32.mrb[24].mxu0 }
0x10af   :  { %v1947_v52 = vadd.f32 %v3124_v61, %v1861_v3  ;;  %v1941_v34 = vpop.f32.mrb[25].mxu0 }
0x10b0   :  { %v1942_v32 = vadd.f32 %v1941_v34, %v1861_v3 }
0x10b1   :  { %v1961_v43 = vadd.f32 %v1947_v52, %v4389_v22  ;;  %v2576_v22 = vld [vmem:[%s4702_s2 + $0x78] sm:$0xff] }
0x10b2   :  { %v1960_v24 = vadd.f32 %v1942_v32, %v4387_v17  ;;  %v2578_v17 = vld [vmem:[%s4702_s2 + $0x88] sm:$0xff] }
0x10b3   :  { %v1967_v21 = vsel %vm62_vm0, %v1961_v43, 0.0  ;;  %v3676_v42 = vpack.i.bf16 %v2578_v17, %v2576_v22  ;;  %v3452_v20 = vpack.c.bf16 %v2578_v17, %v2576_v22 }
0x10b4   :  { %1968 = vadd.xlane.f32.xlu1 %v1967_v21  ;;  %v1964_v25 = vsel %vm62_vm0, %v1960_v24, 0.0 }
0x10b5   :  { %1965 = vadd.xlane.f32.xlu0 %v1964_v25  ;;  %3453 = vmatprep.subr.bf16.mxu1 %v3452_v20 }
0x10b6   :  { %3455 = vmatpush3.bf16.msra.mxu1 %v3452_v20 }
0x10c5   :  { %3672 = vrot.lane.b32.xlu1 %v3671_v30, %s3804_s15 }
0x10c9   :  { %3677 = vrot.lane.b32.xlu1 %v3676_v42, %s3804_s15 }
0x10cd   :  { %2182 = vrot.lane.b32.xlu1 %v4606_v7, %s3804_s15 }
0x10ea   :  { %v3127_v38 = vpop.f32.mrb[26].mxu0 }
0x10eb   :  { %v1957_v2 = vadd.f32 %v3127_v38, %v1861_v3  ;;  %v1951_v26 = vpop.f32.mrb[27].mxu0 }
0x10ec   :  { %v1952_v12 = vadd.f32 %v1951_v26, %v1861_v3 }
0x10ed   :  { %v4611_v41 = vadd.f32 %v1957_v2, %v4399_v28 }
0x10ee   :  { %v1962_v39 = vadd.f32 %v1952_v12, %v4395_v27 }
0x10ef   :  { %v1973_v23 = vsel %vm62_vm0, %v4611_v41, 0.0 }
0x10f0   :  { %v1970_v11 = vsel %vm62_vm0, %v1962_v39, 0.0 }
0x10f1   :  { %1974 = vadd.xlane.f32.xlu1 %v1973_v23 }
0x1141   :  { %v1969_v59 = vpop.xlane.xlu1 %1968 }
0x1142   :  { %v1977_v62 = vmul.f32 0.03125, %v1969_v59  ;;  %v1966_v56 = vpop.xlane.xlu0 %1965 }
0x1143   :  { %v1976_v53 = vmul.f32 0.03125, %v1966_v56 }
0x1144   :  { %v1981_v0 = vsub.f32 %v1961_v43, %v1977_v62 }
0x1145   :  { %v1980_v9 = vsub.f32 %v1960_v24, %v1976_v53  ;;  %v3673_v58 = vpop.permute.xlu1 %3672 }
0x1146   :  { %v3675_v49 = vunpack.i.h.bf16 %v3673_v58  ;;  %v3674_v57 = vunpack.i.l.bf16 %v3673_v58  ;;  %v1985_v31 = vmul.f32 %v1981_v0, %v1981_v0 }
0x1147   :  { %v1984_v60 = vmul.f32 %v1980_v9, %v1980_v9 }
0x1148   :  { %v3456_v1 = vpack.c.bf16 %v3675_v49, %v3674_v57  ;;  %v1991_v40 = vsel %vm62_vm0, %v1985_v31, 0.0 }
0x1149   :  { %v1988_v14 = vsel %vm62_vm0, %v1984_v60, 0.0  ;;  %v3678_v28 = vpop.permute.xlu1 %3677 }
0x114a   :  { %1989 = vadd.xlane.f32.xlu0 %v1988_v14  ;;  %v3680_v6 = vunpack.i.h.bf16 %v3678_v28  ;;  %v3679_v4 = vunpack.i.l.bf16 %v3678_v28  ;;  %3458 = vmatprep.subr.msk.bf16.mxu0 %vm4311_vm13, %v3456_v1 }
0x114b   :  { %3461 = vmatpush3.bf16.xpose.msk.msra.mxu0 %vm4311_vm13, %v3456_v1 }
0x114c   :  { %v3462_v10 = vpack.c.bf16 %v3680_v6, %v3679_v4 }
0x114d   :  { %v2183_v56 = vpop.permute.xlu1 %2182 }
0x114e   :  { %1992 = vadd.xlane.f32.xlu0 %v1991_v40  ;;  %3464 = vmatprep.subr.msk.bf16.mxu0 %vm4311_vm13, %v3462_v10 }
0x1153   :  { %3467 = vmatpush3.bf16.xpose.msk.msra.mxu0 %vm4311_vm13, %v3462_v10 }
0x1164   :  { %2025 = vrot.lane.b32.xlu0 %v4628_v47, %s3803_s11 }
0x1183   :  { %1971 = vadd.xlane.f32.xlu0 %v1970_v11 }
0x11d7   :  { %v1990_v55 = vpop.xlane.xlu0 %1989 }
0x11d8   :  { %v2000_v13 = vmul.f32 0.03125, %v1990_v55 }
0x11da   :  { %v2004_v51 = vadd.f32 1e-12, %v2000_v13 }
0x11db   :  { %v1993_v44 = vpop.xlane.xlu0 %1992 }
0x11dc   :  { %3745 = vrsqrt.f32 %v2004_v51  ;;  %v2001_v29 = vmul.f32 0.03125, %v1993_v44 }
0x11de   :  { %v2005_v35 = vadd.f32 1e-12, %v2001_v29 }
0x11df   :  { %v4634_v63 = vpop.permute.xlu0 %2025 }
0x11e0   :  { %3747 = vrsqrt.f32 %v2005_v35 }
0x11e6   :  { %v3746_v45 = vpop.eup %3745 }
0x11e7   :  { %v2012_v48 = vmul.f32 %v3746_v45, %v1980_v9  ;;  %v1975_v9 = vpop.xlane.xlu1 %1974 }
0x11e8   :  { %v1979_v57 = vmul.f32 0.03125, %v1975_v9 }
0x11e9   :  { %v2020_v16 = vmul.f32 %v4628_v47, %v2012_v48 }
0x11ea   :  { %v3748_v50 = vpop.eup %3747  ;;  %v1983_v31 = vsub.f32 %v4611_v41, %v1979_v57 }
0x11eb   :  { %v2013_v19 = vmul.f32 %v3748_v50, %v1981_v0  ;;  %v2028_v27 = vadd.f32 %v4634_v63, %v2020_v16 }
0x11ec   :  { %v1987_v10 = vmul.f32 %v1983_v31, %v1983_v31 }
0x11ed   :  { %v2021_v15 = vmul.f32 %v4628_v47, %v2013_v19  ;;  %3136 = vmatprep.mubr.msk.f32.mxu1 %vm62_vm0, %v2028_v27 }
0x11ee   :  { %v1997_v40 = vsel %vm62_vm0, %v1987_v10, 0.0 }
0x11ef   :  { %v2029_v46 = vadd.f32 %v4634_v63, %v2021_v15  ;;  %v2309_v15 = vld [vmem:[%s4703_s3] sm:$0xff] }
0x11f1   :  { %3137 = vmatmul.mubr.msk.f32.vlgmr.msra.gmra.mrb[20].mxu1 %vm62_vm0, %v2029_v46  ;;  %v2310_v46 = vld [vmem:[%s4703_s3 + $0x8] sm:$0xff] }
0x1210   :  { %v1972_v53 = vpop.xlane.xlu0 %1971 }
0x1211   :  { %v1978_v0 = vmul.f32 0.03125, %v1972_v53 }
0x1213   :  { %v1982_v60 = vsub.f32 %v1962_v39, %v1978_v0 }
0x1215   :  { %v1986_v6 = vmul.f32 %v1982_v60, %v1982_v60 }
0x1217   :  { %v1994_v4 = vsel %vm62_vm0, %v1986_v6, 0.0 }
0x12c4   :  { %v3138_v3 = vpop.f32.mrb[20].mxu1 }
0x12c5   :  { %v2120_v61 = vadd.f32 %v3138_v3, %v4606_v7  ;;  %v2114_v52 = vpop.f32.mrb[21].mxu1  ;;  %v3805_v3 = vmov 0.0|0.0  }
0x12c6   :  { %v2115_v34 = vadd.f32 %v2114_v52, %v4606_v7  ;;  %3468 = vmatprep.subr.bf16.mxu1 %v3805_v3 }
0x12c7   :  { %v2138_v32 = vmul.f32 0.044715, %v2120_v61  ;;  %v2134_v23 = vmul.f32 0.5, %v2120_v61 }
0x12c8   :  { %v2137_v43 = vmul.f32 0.044715, %v2115_v34  ;;  %v2133_v2 = vmul.f32 0.5, %v2115_v34 }
0x12c9   :  { %v2142_v24 = vmul.f32 %v2138_v32, %v2120_v61 }
0x12ca   :  { %v2141_v21 = vmul.f32 %v2137_v43, %v2115_v34 }
0x12cb   :  { %v2146_v25 = vmul.f32 %v2142_v24, %v2120_v61 }
0x12cc   :  { %v2145_v5 = vmul.f32 %v2141_v21, %v2115_v34 }
0x12cd   :  { %v2150_v18 = vadd.f32 %v2146_v25, %v2120_v61  ;;  %v3469_v61 = vpack.c.bf16 %v2310_v46, %v2309_v15 }
0x12ce   :  { %v2149_v30 = vadd.f32 %v2145_v5, %v2115_v34  ;;  %v2312_v34 = vld [vmem:[%s4703_s3 + $0x18] sm:$0xff] }
0x12cf   :  { %v2154_v22 = vmul.f32 0.7978846, %v2150_v18  ;;  %3470 = vmatpush3.bf16.msra.mxu1 %v3469_v61 }
0x12d0   :  { %v2153_v17 = vmul.f32 0.7978846, %v2149_v30  ;;  %3471 = vmatprep.subr.bf16.mxu1 %v3805_v3 }
0x12d1   :  { %3749 = vtanh.f32 %v2154_v22 }
0x12d2   :  { %3751 = vtanh.f32 %v2153_v17 }
0x12db   :  { %v3750_v42 = vpop.eup %3749 }
0x12dc   :  { %v3752_v33 = vpop.eup %3751  ;;  %v2162_v38 = vadd.f32 1.0, %v3750_v42 }
0x12dd   :  { %v2161_v26 = vadd.f32 1.0, %v3752_v33 }
0x12de   :  { %v2166_v62 = vmul.f32 %v2162_v38, %v2134_v23 }
0x12df   :  { %v2165_v59 = vmul.f32 %v2161_v26, %v2133_v2 }
0x12e1   :  { %3150 = vmatprep.mubr.msk.f32.mxu0 %vm1084_vm12, %v2165_v59 }
0x12e2   :  { %3151 = vmatmul.mubr.msk.f32.vlgmr.msra.gmra.mrb[28].mxu0 %vm1084_vm12, %v2166_v62 }
0x13b5   :  { %v3152_v58 = vpop.f32.mrb[28].mxu0 }
0x13b6   :  { %v2271_v49 = vpop.f32.mrb[29].mxu0 }
0x13b7   :  { %v2272_v1 = vadd.f32 %v2271_v49, %v2183_v56 }
0x13b9   :  { %v2287_v14 = vadd.f32 %v2272_v1, %v2028_v27 }
0x13bb   :  { %v2288_v28 = vsel %vm62_vm0, %v2287_v14, 0.0 }
0x13bc   :  { %2289 = vadd.xlane.f32.xlu0 %v2288_v28  ;;  %v2621_v28 = vld [vmem:[%s4703_s3 + $0x20] ss:$0 sm:$0xff] }
0x13c0   :  { %1995 = vadd.xlane.f32.xlu0 %v1994_v4 }
0x13c4   :  { %1998 = vadd.xlane.f32.xlu0 %v1997_v40 }
0x13da   :  { %2301 = vrot.lane.b32.xlu0 %v4628_v47, %s3804_s15 }
0x1449   :  { %v2290_v54 = vpop.xlane.xlu0 %2289 }
0x144a   :  { %v2291_v20 = vmul.f32 0.03125, %v2290_v54 }
0x144c   :  { %v2292_v12 = vsub.f32 %v2287_v14, %v2291_v20 }
0x144d   :  { %v1996_v39 = vpop.xlane.xlu0 %1995 }
0x144e   :  { %v2002_v11 = vmul.f32 0.03125, %v1996_v39  ;;  %v2293_v41 = vmul.f32 %v2292_v12, %v2292_v12 }
0x1450   :  { %v2006_v55 = vadd.f32 1e-12, %v2002_v11  ;;  %v2294_v13 = vsel %vm62_vm0, %v2293_v41, 0.0 }
0x1451   :  { %2295 = vadd.xlane.f32.xlu1 %v2294_v13  ;;  %v1999_v51 = vpop.xlane.xlu0 %1998 }
0x1452   :  { %3753 = vrsqrt.f32 %v2006_v55  ;;  %v2003_v44 = vmul.f32 0.03125, %v1999_v51 }
0x1454   :  { %v2007_v29 = vadd.f32 1e-12, %v2003_v44 }
0x1455   :  { %v2302_v25 = vpop.permute.xlu0 %2301 }
0x1456   :  { %3755 = vrsqrt.f32 %v2007_v29 }
0x145c   :  { %v3754_v35 = vpop.eup %3753 }
0x145d   :  { %v2014_v45 = vmul.f32 %v3754_v35, %v1982_v60 }
0x145f   :  { %v2022_v48 = vmul.f32 %v4628_v47, %v2014_v45 }
0x1460   :  { %v3756_v16 = vpop.eup %3755 }
0x1461   :  { %v2030_v50 = vadd.f32 %v4634_v63, %v2022_v48  ;;  %v2015_v19 = vmul.f32 %v3756_v16, %v1983_v31 }
0x1462   :  { %2305 = vrot.lane.b32.xlu1 %v4628_v47, %s3802_s30 }
0x1463   :  { %3139 = vmatprep.mubr.msk.f32.mxu1 %vm62_vm0, %v2030_v50  ;;  %v2023_v27 = vmul.f32 %v4628_v47, %v2015_v19  ;;  %v2311_v47 = vld [vmem:[%s4703_s3 + $0x10] sm:$0xff]  ;;  %s3807_s3 = smov [#allocation2]  }
0x1464   :  { %v3472_v32 = vpack.c.bf16 %v2312_v34, %v2311_v47  ;;  %s2521_s0 = sshll.u32 %s3807_s3, 4  ;;  %s2522_s0 = int_to_ptr.vmem [resolvable:$true] %s2521_s0 }
0x1465   :  { %v2031_v52 = vadd.f32 %v4634_v63, %v2023_v27  ;;  %s3777_s23 = scalar_lea.vmem %s2522_s0, 16  ;;  %s3781_s24 = scalar_lea.vmem %s2522_s0, 32 }
0x1466   :  { %3473 = vmatpush3.bf16.msra.mxu1 %v3472_v32  ;;  %p3778_p0 = scmp.ne.s32.totalorder %s2522_s0, %s3777_s23  ;;  %p3782_p1 = scmp.lt.s32.totalorder %s2522_s0, %s2522_s0 }
0x1467   :  { %3140 = vmatmul.mubr.msk.f32.gmra.mrb[22].mxu1 %vm62_vm0, %v2031_v52  ;;  %3167 = vmatprep.subr.mxu1 %v3801_v37  ;;  %p3783_p2 = scmp.lt.s32.totalorder %s3781_s24, %s3777_s23 }
0x1468   :  { %3164 = vmatprep.mubr.msk.f32.mxu1 %vm3806_vm14, %v3801_v37 }
0x1469   :  { %p3784_p3 = por %p3783_p2, %p3782_p1 }
0x146b   :  { %p3785_p4 = pnand %p3784_p3, %p3778_p0 }
0x14de   :  { %v2296_v63 = vpop.xlane.xlu1 %2295 }
0x14df   :  { %v2297_v43 = vmul.f32 0.03125, %v2296_v63 }
0x14e1   :  { %v2298_v24 = vadd.f32 1e-12, %v2297_v43 }
0x14e2   :  { %v2306_v18 = vpop.permute.xlu1 %2305 }
0x14e3   :  { %3757 = vrsqrt.f32 %v2298_v24 }
0x14ed   :  { %v3758_v21 = vpop.eup %3757 }
0x14ee   :  { %v2300_v5 = vmul.f32 %v3758_v21, %v2292_v12 }
0x14f0   :  { %v2304_v30 = vmul.f32 %v2302_v25, %v2300_v5 }
0x14f2   :  { %v2308_v22 = vadd.f32 %v2306_v18, %v2304_v30 }
0x14f4   :  { %3165 = vmatmul.mubr.msk.f32.vlgmr.msra.gmra.mrb[24].mxu1 %vm62_vm0, %v2308_v22 }
0x14f5   :  { %3169 = vmatprep.mubr.msk.f32.mxu1 %vm3806_vm14, %v3801_v37 }
0x153a   :  { %v3141_v17 = vpop.f32.mrb[22].mxu1 }
0x153b   :  { %v2130_v42 = vadd.f32 %v3141_v17, %v4606_v7  ;;  %v2124_v33 = vpop.f32.mrb[23].mxu1 }
0x153c   :  { %v2125_v38 = vadd.f32 %v2124_v33, %v4606_v7 }
0x153d   :  { %v2140_v2 = vmul.f32 0.044715, %v2130_v42  ;;  %v2136_v14 = vmul.f32 0.5, %v2130_v42 }
0x153e   :  { %v2139_v26 = vmul.f32 0.044715, %v2125_v38  ;;  %v2135_v60 = vmul.f32 0.5, %v2125_v38 }
0x153f   :  { %v2144_v23 = vmul.f32 %v2140_v2, %v2130_v42 }
0x1540   :  { %v2143_v59 = vmul.f32 %v2139_v26, %v2125_v38 }
0x1541   :  { %v2148_v62 = vmul.f32 %v2144_v23, %v2130_v42 }
0x1542   :  { %v2147_v56 = vmul.f32 %v2143_v59, %v2125_v38 }
0x1543   :  { %v2152_v53 = vadd.f32 %v2148_v62, %v2130_v42 }
0x1544   :  { %v2151_v0 = vadd.f32 %v2147_v56, %v2125_v38 }
0x1545   :  { %v2156_v9 = vmul.f32 0.7978846, %v2152_v53 }
0x1546   :  { %v2155_v58 = vmul.f32 0.7978846, %v2151_v0 }
0x1547   :  { %3759 = vtanh.f32 %v2156_v9 }
0x1548   :  { %3761 = vtanh.f32 %v2155_v58 }
0x1551   :  { %v3760_v49 = vpop.eup %3759 }
0x1552   :  { %v3762_v37 = vpop.eup %3761  ;;  %v2164_v57 = vadd.f32 1.0, %v3760_v49 }
0x1553   :  { %v2163_v1 = vadd.f32 1.0, %v3762_v37 }
0x1554   :  { %v2168_v7 = vmul.f32 %v2164_v57, %v2136_v14 }
0x1555   :  { %v2167_v31 = vmul.f32 %v2163_v1, %v2135_v60 }
0x1557   :  { %3153 = vmatprep.mubr.msk.f32.mxu0 %vm1084_vm12, %v2167_v31 }
0x1558   :  { %3154 = vmatmul.mubr.msk.f32.gmra.mrb[30].mxu0 %vm1084_vm12, %v2168_v7 }
0x15c7   :  { %v2387_v6 = vpop.f32.mrb[24].mxu1 }
0x15c8   :  { %v2388_v4 = vadd.f32 %v2621_v28, %v2387_v6  ;;  %v3166_v10 = vpop.f32.mrb[25].mxu1 }
0x15ca   :  { %3763 = vtanh.f32 %v2388_v4 }
0x15d4   :  { %v3764_v40 = vpop.eup %3763 }
0x15d5   :  { %v2392_v54 = vmul.f32 %v3764_v40, %v3764_v40 }
0x15d7   :  { %v2401_v20 = vsel %vm2400_vm15, %v2392_v54, 0.0  ;;  %v2394_v12 = vsel %vm2393_vm1, %v2392_v54, 0.0 }
0x15d8   :  { %2402 = vadd.xlane.f32.xlu1 %v2401_v20  ;;  %2395 = vadd.xlane.f32.xlu0 %v2394_v12 }
0x162b   :  { %v3155_v39 = vpop.f32.mrb[30].mxu0 }
0x162c   :  { %v2280_v11 = vpop.f32.mrb[31].mxu0 }
0x1665   :  { %v2403_v41 = vpop.xlane.xlu1 %2402  ;;  %v2396_v55 = vpop.xlane.xlu0 %2395 }
0x1666   :  { %3765 = vrsqrt.f32 %v2403_v41 }
0x1667   :  { %3767 = vrsqrt.f32 %v2396_v55 }
0x1670   :  { %v3766_v13 = vpop.eup %3765 }
0x1671   :  { %v3768_v51 = vpop.eup %3767  ;;  %v2405_v44 = vmul.f32 %v3766_v13, %v3764_v40 }
0x1672   :  { %v2398_v29 = vmul.f32 20.0, %v3768_v51 }
0x1673   :  { %v2407_v35 = vrot.slane %v2405_v44, 2 }
0x1674   :  { %v2399_v45 = vmul.f32 %v3764_v40, %v2398_v29 }
0x1675   :  { %3168 = vmatpush3.xpose.msk.msra.mxu1 %vm62_vm0, %v2407_v35 }
0x1678   :  { %3170 = vmatmul.mubr.msk.f32.vlgmr.msra.gmra.mrb[26].mxu1 %vm62_vm0, %v2399_v45  ;;  %vm2504_vm0 = vcmask 1041408  }
0x174b   :  { %v2479_v48 = vpop.f32.mrb[26].mxu1 }
0x174c   :  { %v3171_v16 = vpop.f32.mrb[27].mxu1  ;;  %v2484_v50 = vsel %vm2483_vm2, %v2479_v48, -inf  ;;  %v2499_v19 = vsel %vm2498_vm3, %v2479_v48, 0.0 }
0x174d   :  { %2485 = vmax.xlane.f32.xlu0 %v2484_v50  ;;  %v2500_v27 = vsel %vm2483_vm2, %v2499_v19, 0.0 }
0x1751   :  { %2501 = vadd.xlane.f32.xlu0 %v2500_v27 }
0x17da   :  { %v2486_v15 = vpop.xlane.xlu0 %2485 }
0x17db   :  { %v2487_v46 = vsub.f32 %v2479_v48, %v2486_v15 }
0x17dd   :  { %v2488_v3 = vmul.f32 1.442695, %v2487_v46 }
0x17de   :  { %v2502_v36 = vpop.xlane.xlu0 %2501 }
0x17df   :  { %3769 = vpow2.f32 %v2488_v3 }
0x17e9   :  { %v3770_v61 = vpop.eup %3769 }
0x17ea   :  { %v2490_v52 = vsel %vm2483_vm2, %v3770_v61, 0.0 }
0x17eb   :  { %2491 = vadd.xlane.f32.xlu1 %v2490_v52 }
0x1878   :  { %v2492_v47 = vpop.xlane.xlu1 %2491 }
0x1879   :  { %3771 = vlog2.f32 %v2492_v47 }
0x1883   :  { %v3772_v34 = vpop.eup %3771 }
0x1884   :  { %v2494_v32 = vmul.f32 0.6931472, %v3772_v34 }
0x1886   :  { %v2495_v63 = vadd.f32 %v2494_v32, %v2486_v15 }
0x1888   :  { %v2503_v8 = vsub.f32 %v2495_v63, %v2502_v36 }
0x188a   :  { %v2505_v43 = vsel %vm2504_vm0, %v2503_v8, 0.0 }
0x188b   :  { %v2506_v24 = vrot.slane %v2505_v43, 4 }
0x188d   :  { %v2507_v21 = vadd.f32 %v2506_v24, %v2505_v43 }
0x188f   :  { %v2508_v25 = vrot.slane %v2507_v21, 2 }
0x1891   :  { %v2509_v5 = vadd.f32 %v2508_v25, %v2507_v21 }
0x1893   :  { %v2510_v18 = vrot.slane %v2509_v5, 1 }
0x1895   :  { %v2511_v30 = vadd.f32 %v2510_v18, %v2509_v5 }
0x1897   :  { %v2512_v22 = vmul.f32 0.5, %v2511_v30 }
0x1899   :  { %2514 = vst.msk [vmem:[#allocation2] sm:$0x1] %vm2513_vm4, %v2512_v22 }
0x189a   :  { %3788 = shalt.err (!%p3785_p4)
}
0x189b   :  { %s3789_s27 = scalar_lea.hbm %s4704_s4, 16 }
0x189c   :  { %p3790_p5 = scmp.ne.s32.totalorder %s4704_s4, %s3789_s27  ;;  %p3793_p6 = scmp.lt.u32.totalorder %s3789_s27, %s4704_s4 }
0x189e   :  { %p3795_p7 = pnand %p3793_p6, %p3790_p5 }
0x18a0   :  { %3798 = shalt.err (!%p3795_p7)
}
0x18a1   :  { %2524 = dma.vmem_to_hbm [thread:$0]  %s2522_s0, 16, %s4704_s4, [#allocation3]  }
0x18a2   :  { %3799 = dma.done.wait [#allocation3], 16  }
0x18a3   :  { %3800 = vsyncadd [#allocation3], 4294967280 }
0x18a4   :  { %2528 = vsyncpa [#allocation3], 1 }

</bundles_post_ra>
